<compile_context>
chip_gen: v7x
topology: tpu7x:2x2x1
jax: 0.10.0
libtpu: 0.0.40
codegen_flags: <defaults>
</compile_context>

<pallas_src>
import math

import jax
import jax.numpy as jnp
from jax.experimental import pallas as pl
from jax.experimental.pallas import tpu as pltpu

# ----------------------------- small BERT config -----------------------------
B, S, H = 2, 8, 32           # batch, seq, hidden
NUM_HEADS = 2
HEAD_DIM = H // NUM_HEADS
INTER = 64                   # intermediate (FFN) size
VOCAB = 100
TYPE_VOCAB = 2
MAX_POS = 16
NUM_LAYERS = 2
NUM_SLOT_LABELS = 5
LANE_PAD = 128               # lane-dense padding for the classifier logits
LN_EPS = 1e-12
ATT_SCALE = 1.0 / math.sqrt(HEAD_DIM)

_SMEM = pltpu.MemorySpace.SMEM


def _layernorm(x, g, b):
    mu = jnp.mean(x, axis=-1, keepdims=True)
    var = jnp.mean((x - mu) ** 2, axis=-1, keepdims=True)
    return (x - mu) * jax.lax.rsqrt(var + LN_EPS) * g + b


# ------------------------------ fused Pallas kernel ---------------------------
def slot_bert_kernel(
        emb_ref, bias_ref, maskf_ref, labels_ref,          # data
        embg_ref, embb_ref,                                 # embedding LN
        wqkv_ref, bqkv_ref, wo_ref, bo_ref,                 # attention (per layer)
        ln1g_ref, ln1b_ref,
        w1_ref, b1_ref, w2_ref, b2_ref,                     # FFN (per layer)
        ln2g_ref, ln2b_ref,
        clsw_ref, clsb_ref,                                 # classifier (padded)
        logits_ref, loss_ref,                               # outputs
        hid_ref):                                           # VMEM-resident hidden
    layer = pl.program_id(0)
    last = NUM_LAYERS - 1

    # -- layer 0: embedding LayerNorm into the VMEM-resident hidden state --
    @pl.when(layer == 0)
    def _():
        hid_ref[...] = _layernorm(emb_ref[...], embg_ref[...], embb_ref[...])

    x = hid_ref[...]                                        # [B*S, H]

    # -- fused QKV projection: single [B*S,H] @ [H,3H] MXU pass --
    qkv = jnp.dot(x, wqkv_ref[0],
                  preferred_element_type=jnp.float32) + bqkv_ref[0]   # [B*S, 3H]
    att_bias = bias_ref[...]                                # [B, 1, S], precomputed

    # -- multi-head attention (static head count); concat-free output proj --
    wo = wo_ref[0]                                          # [H, H]
    attn_out = jnp.zeros((B * S, H), jnp.float32)
    for h in range(NUM_HEADS):
        lo = h * HEAD_DIM
        qh = qkv[:, lo:lo + HEAD_DIM].reshape(B, S, HEAD_DIM)
        kh = qkv[:, H + lo:H + lo + HEAD_DIM].reshape(B, S, HEAD_DIM)
        vh = qkv[:, 2 * H + lo:2 * H + lo + HEAD_DIM].reshape(B, S, HEAD_DIM)

        scores = jnp.einsum('bqd,bkd->bqk', qh, kh,
                            preferred_element_type=jnp.float32) * ATT_SCALE
        scores = scores + att_bias
        scores = scores - jnp.max(scores, axis=-1, keepdims=True)
        p = jnp.exp(scores)
        p = p * pl.reciprocal(jnp.sum(p, axis=-1, keepdims=True), approx=True)
        ctx = jnp.einsum('bqk,bkd->bqd', p, vh,
                         preferred_element_type=jnp.float32)          # [B, S, D]
        # fold head h straight into the output projection (no lane-axis concat)
        attn_out = attn_out + jnp.dot(ctx.reshape(B * S, HEAD_DIM),
                                      wo[lo:lo + HEAD_DIM, :],
                                      preferred_element_type=jnp.float32)
    attn_out = attn_out + bo_ref[0]

    h1 = _layernorm(x + attn_out, ln1g_ref[0], ln1b_ref[0])           # [B*S, H]

    # -- feed-forward --
    ff = jnp.dot(h1, w1_ref[0], preferred_element_type=jnp.float32) + b1_ref[0]
    # TODO(synk): HF BERT uses exact erf-GELU; tanh approximation used here.
    ff = jax.nn.gelu(ff, approximate=True)
    ff = jnp.dot(ff, w2_ref[0], preferred_element_type=jnp.float32) + b2_ref[0]
    out = _layernorm(h1 + ff, ln2g_ref[0], ln2b_ref[0])

    # carry the hidden state to the next layer (not needed after the last one)
    @pl.when(layer < last)
    def _():
        hid_ref[...] = out

    # -- last layer: slot classifier + masked mean cross-entropy, fused --
    @pl.when(layer == last)
    def _():
        # lane-dense [B*S, 128] logits slab (dropout = identity in eval mode)
        logits = jnp.dot(out, clsw_ref[...],
                         preferred_element_type=jnp.float32) + clsb_ref[...]
        logits_ref[...] = logits

        col = jax.lax.broadcasted_iota(jnp.int32, (B * S, LANE_PAD), 1)
        # mask padded label columns before the log-sum-exp
        masked = jnp.where(col < NUM_SLOT_LABELS, logits, jnp.float32(-1e30))
        m = jnp.max(masked, axis=-1, keepdims=True)
        lse = jnp.log(jnp.sum(jnp.exp(masked - m), axis=-1, keepdims=True)) + m

        onehot = (col == labels_ref[...]).astype(jnp.float32)          # labels < 5
        picked = jnp.sum(onehot * logits, axis=-1, keepdims=True)      # [B*S, 1]
        nll = lse - picked                                             # [B*S, 1]

        mk = maskf_ref[...]                                            # [B*S, 1]
        num = jnp.sum(nll * mk)
        den = jnp.maximum(jnp.sum(mk), 1.0)   # guard: all-padded batch
        loss_ref[0, 0] = num / den


# ------------------------------ BlockSpec helpers -----------------------------
def _fixed_spec(shape):
    zeros = (0,) * len(shape)
    return pl.BlockSpec(shape, lambda l, _z=zeros: _z)


def _stacked_spec(shape):
    blk = (1,) + tuple(shape[1:])
    zeros = (0,) * (len(shape) - 1)
    return pl.BlockSpec(blk, lambda l, _z=zeros: (l,) + _z)


# ------------------------------ parameter setup -------------------------------
def init_params(key):
    def normal(key, shape, scale=0.02):
        return (scale * jax.random.normal(key, shape)).astype(jnp.float32)

    keys = iter(jax.random.split(key, 16))
    params = {
        "word_emb": normal(next(keys), (VOCAB, H)),
        "pos_emb": normal(next(keys), (MAX_POS, H)),
        "type_emb": normal(next(keys), (TYPE_VOCAB, H)),
        "emb_ln_g": jnp.ones((1, H), jnp.float32),
        "emb_ln_b": jnp.zeros((1, H), jnp.float32),
        # stacked per-layer weights, [L, ...]
        "wqkv": normal(next(keys), (NUM_LAYERS, H, 3 * H)),
        "bqkv": jnp.zeros((NUM_LAYERS, 1, 3 * H), jnp.float32),
        "wo": normal(next(keys), (NUM_LAYERS, H, H)),
        "bo": jnp.zeros((NUM_LAYERS, 1, H), jnp.float32),
        "ln1g": jnp.ones((NUM_LAYERS, 1, H), jnp.float32),
        "ln1b": jnp.zeros((NUM_LAYERS, 1, H), jnp.float32),
        "w1": normal(next(keys), (NUM_LAYERS, H, INTER)),
        "b1": jnp.zeros((NUM_LAYERS, 1, INTER), jnp.float32),
        "w2": normal(next(keys), (NUM_LAYERS, INTER, H)),
        "b2": jnp.zeros((NUM_LAYERS, 1, H), jnp.float32),
        "ln2g": jnp.ones((NUM_LAYERS, 1, H), jnp.float32),
        "ln2b": jnp.zeros((NUM_LAYERS, 1, H), jnp.float32),
        # slot classifier, zero-padded to 128 lanes for lane-dense stores
        "cls_w": jnp.pad(normal(next(keys), (H, NUM_SLOT_LABELS)),
                         ((0, 0), (0, LANE_PAD - NUM_SLOT_LABELS))),
        "cls_b": jnp.zeros((1, LANE_PAD), jnp.float32),
    }
    return params


# ------------------------------ forward pass ----------------------------------
@jax.jit
def slot_bert_forward(params, input_ids, attention_mask, token_type_ids,
                      slot_labels):
    # --- glue: embedding gathers (word + position + token_type) ---
    positions = jnp.arange(S, dtype=jnp.int32)[None, :]                     # [1, S]
    emb = (jnp.take(params["word_emb"], input_ids, axis=0)
           + jnp.take(params["pos_emb"], positions, axis=0)
           + jnp.take(params["type_emb"], token_type_ids, axis=0))          # [B,S,H]

    maskf = attention_mask.astype(jnp.float32)
    att_bias = (1.0 - maskf)[:, None, :] * -10000.0          # [B,1,S], computed once

    emb2d = emb.reshape(B * S, H)
    maskf2d = maskf.reshape(B * S, 1)
    labels2d = slot_labels.astype(jnp.int32).reshape(B * S, 1)

    in_specs = [
        _fixed_spec((B * S, H)),                      # emb
        _fixed_spec((B, 1, S)),                       # attention bias
        _fixed_spec((B * S, 1)),                      # mask (loss)
        _fixed_spec((B * S, 1)),                      # labels
        _fixed_spec((1, H)),                          # emb LN gamma
        _fixed_spec((1, H)),                          # emb LN beta
        _stacked_spec((NUM_LAYERS, H, 3 * H)),        # Wqkv
        _stacked_spec((NUM_LAYERS, 1, 3 * H)),        # bqkv
        _stacked_spec((NUM_LAYERS, H, H)),            # Wo
        _stacked_spec((NUM_LAYERS, 1, H)),            # bo
        _stacked_spec((NUM_LAYERS, 1, H)),            # LN1 gamma
        _stacked_spec((NUM_LAYERS, 1, H)),            # LN1 beta
        _stacked_spec((NUM_LAYERS, H, INTER)),        # W1
        _stacked_spec((NUM_LAYERS, 1, INTER)),        # b1
        _stacked_spec((NUM_LAYERS, INTER, H)),        # W2
        _stacked_spec((NUM_LAYERS, 1, H)),            # b2
        _stacked_spec((NUM_LAYERS, 1, H)),            # LN2 gamma
        _stacked_spec((NUM_LAYERS, 1, H)),            # LN2 beta
        _fixed_spec((H, LANE_PAD)),                   # cls W (padded)
        _fixed_spec((1, LANE_PAD)),                   # cls b (padded)
    ]
    out_specs = (
        pl.BlockSpec((B * S, LANE_PAD), lambda l: (0, 0)),                 # logits
        pl.BlockSpec((1, 1), lambda l: (0, 0), memory_space=_SMEM),        # loss
    )

    logits_pad, loss = pl.pallas_call(
        slot_bert_kernel,
        out_shape=(jax.ShapeDtypeStruct((B * S, LANE_PAD), jnp.float32),
                   jax.ShapeDtypeStruct((1, 1), jnp.float32)),
        grid_spec=pltpu.PrefetchScalarGridSpec(
            num_scalar_prefetch=0,
            grid=(NUM_LAYERS,),
            in_specs=in_specs,
            out_specs=out_specs,
            scratch_shapes=[pltpu.VMEM((B * S, H), jnp.float32)]),
        compiler_params=pltpu.CompilerParams(
            dimension_semantics=("arbitrary",)),
    )(emb2d, att_bias, maskf2d, labels2d,
      params["emb_ln_g"], params["emb_ln_b"],
      params["wqkv"], params["bqkv"], params["wo"], params["bo"],
      params["ln1g"], params["ln1b"],
      params["w1"], params["b1"], params["w2"], params["b2"],
      params["ln2g"], params["ln2b"],
      params["cls_w"], params["cls_b"])

    slot_logits = logits_pad.reshape(B, S, LANE_PAD)[:, :, :NUM_SLOT_LABELS]
    return slot_logits, loss[0, 0]


# ----------------------------------- main --------------------------------------
if __name__ == "__main__":
    key = jax.random.PRNGKey(0)
    k_param, k_ids, k_labels = jax.random.split(key, 3)

    params = init_params(k_param)

    input_ids = jax.random.randint(k_ids, (B, S), 0, VOCAB, dtype=jnp.int32)
    attention_mask = jnp.array(
        [[1, 1, 1, 1, 1, 1, 1, 1],
         [1, 1, 1, 1, 1, 0, 0, 0]], dtype=jnp.int32)
    token_type_ids = jnp.zeros((B, S), dtype=jnp.int32)
    slot_labels = jax.random.randint(k_labels, (B, S), 0, NUM_SLOT_LABELS,
                                     dtype=jnp.int32)

    slot_logits, loss = slot_bert_forward(params, input_ids, attention_mask,
                                          token_type_ids, slot_labels)
    jax.block_until_ready((slot_logits, loss))

    assert slot_logits.shape == (B, S, NUM_SLOT_LABELS)
    assert loss.shape == ()
    assert bool(jnp.isfinite(loss))
    print("KERNEL_OK")
</pallas_src>

<mosaic_0001>
module attributes {stable_mosaic.version = 11 : i64} {
  func.func @slot_bert_kernel(%arg0: i32, %arg1: memref<16x32xf32, #tpu.memory_space<vmem>>, %arg2: memref<2x1x8xf32, #tpu.memory_space<vmem>>, %arg3: memref<16x1xf32, #tpu.memory_space<vmem>>, %arg4: memref<16x1xi32, #tpu.memory_space<vmem>>, %arg5: memref<1x32xf32, #tpu.memory_space<vmem>>, %arg6: memref<1x32xf32, #tpu.memory_space<vmem>>, %arg7: memref<1x32x96xf32, #tpu.memory_space<vmem>>, %arg8: memref<1x1x96xf32, #tpu.memory_space<vmem>>, %arg9: memref<1x32x32xf32, #tpu.memory_space<vmem>>, %arg10: memref<1x1x32xf32, #tpu.memory_space<vmem>>, %arg11: memref<1x1x32xf32, #tpu.memory_space<vmem>>, %arg12: memref<1x1x32xf32, #tpu.memory_space<vmem>>, %arg13: memref<1x32x64xf32, #tpu.memory_space<vmem>>, %arg14: memref<1x1x64xf32, #tpu.memory_space<vmem>>, %arg15: memref<1x64x32xf32, #tpu.memory_space<vmem>>, %arg16: memref<1x1x32xf32, #tpu.memory_space<vmem>>, %arg17: memref<1x1x32xf32, #tpu.memory_space<vmem>>, %arg18: memref<1x1x32xf32, #tpu.memory_space<vmem>>, %arg19: memref<32x128xf32, #tpu.memory_space<vmem>>, %arg20: memref<1x128xf32, #tpu.memory_space<vmem>>, %arg21: memref<16x128xf32, #tpu.memory_space<vmem>>, %arg22: memref<1x1xf32, #tpu.memory_space<smem>>, %arg23: memref<16x32xf32, #tpu.memory_space<vmem>>) attributes {dimension_semantics = [#tpu.dimension_semantics<arbitrary>], iteration_bounds = array<i64: 2>, scalar_prefetch = 0 : i64, scratch_operands = 1 : i64, tpu.core_type = #tpu.core_type<tc>, window_params = [{pipeline_mode = #tpu.pipeline_mode<synchronous>, transform_indices = @transform_0, window_bounds = array<i64: 16, 32>}, {pipeline_mode = #tpu.pipeline_mode<synchronous>, transform_indices = @transform_1, window_bounds = array<i64: 2, 1, 8>}, {pipeline_mode = #tpu.pipeline_mode<synchronous>, transform_indices = @transform_2, window_bounds = array<i64: 16, 1>}, {pipeline_mode = #tpu.pipeline_mode<synchronous>, transform_indices = @transform_3, window_bounds = array<i64: 16, 1>}, {pipeline_mode = #tpu.pipeline_mode<synchronous>, transform_indices = @transform_4, window_bounds = array<i64: 1, 32>}, {pipeline_mode = #tpu.pipeline_mode<synchronous>, transform_indices = @transform_5, window_bounds = array<i64: 1, 32>}, {transform_indices = @transform_6, window_bounds = array<i64: 1, 32, 96>}, {transform_indices = @transform_7, window_bounds = array<i64: 1, 1, 96>}, {transform_indices = @transform_8, window_bounds = array<i64: 1, 32, 32>}, {transform_indices = @transform_9, window_bounds = array<i64: 1, 1, 32>}, {transform_indices = @transform_10, window_bounds = array<i64: 1, 1, 32>}, {transform_indices = @transform_11, window_bounds = array<i64: 1, 1, 32>}, {transform_indices = @transform_12, window_bounds = array<i64: 1, 32, 64>}, {transform_indices = @transform_13, window_bounds = array<i64: 1, 1, 64>}, {transform_indices = @transform_14, window_bounds = array<i64: 1, 64, 32>}, {transform_indices = @transform_15, window_bounds = array<i64: 1, 1, 32>}, {transform_indices = @transform_16, window_bounds = array<i64: 1, 1, 32>}, {transform_indices = @transform_17, window_bounds = array<i64: 1, 1, 32>}, {pipeline_mode = #tpu.pipeline_mode<synchronous>, transform_indices = @transform_18, window_bounds = array<i64: 32, 128>}, {pipeline_mode = #tpu.pipeline_mode<synchronous>, transform_indices = @transform_19, window_bounds = array<i64: 1, 128>}, {pipeline_mode = #tpu.pipeline_mode<synchronous>, transform_indices = @transform_20, window_bounds = array<i64: 16, 128>}, {transform_indices = @transform_21, window_bounds = array<i64: 1, 1>}]} {
    %c0_i32 = arith.constant 0 : i32
    %0 = arith.cmpi eq, %arg0, %c0_i32 : i32
    %1 = arith.extui %0 : i1 to i32
    %c0_i32_0 = arith.constant 0 : i32
    %2 = arith.cmpi ne, %1, %c0_i32_0 : i32
    scf.if %2 {
      %c0_73 = arith.constant 0 : index
      %c0_74 = arith.constant 0 : index
      %158 = vector.load %arg1[%c0_73, %c0_74] : memref<16x32xf32, #tpu.memory_space<vmem>>, vector<16x32xf32>
      %c0_75 = arith.constant 0 : index
      %c0_76 = arith.constant 0 : index
      %159 = vector.load %arg5[%c0_75, %c0_76] : memref<1x32xf32, #tpu.memory_space<vmem>>, vector<1x32xf32>
      %c0_77 = arith.constant 0 : index
      %c0_78 = arith.constant 0 : index
      %160 = vector.load %arg6[%c0_77, %c0_78] : memref<1x32xf32, #tpu.memory_space<vmem>>, vector<1x32xf32>
      %cst_79 = arith.constant dense<0.000000e+00> : vector<16xf32>
      %161 = vector.multi_reduction <add>, %158, %cst_79 [1] : vector<16x32xf32> to vector<16xf32>
      %162 = vector.shape_cast %161 : vector<16xf32> to vector<16x1xf32>
      %cst_80 = arith.constant 3.200000e+01 : f32
      %163 = vector.broadcast %cst_80 : f32 to vector<16x1xf32>
      %164 = arith.divf %162, %163 : vector<16x1xf32>
      %165 = vector.broadcast %164 : vector<16x1xf32> to vector<16x32xf32>
      %166 = arith.subf %158, %165 : vector<16x32xf32>
      %167 = arith.mulf %166, %166 : vector<16x32xf32>
      %cst_81 = arith.constant dense<0.000000e+00> : vector<16xf32>
      %168 = vector.multi_reduction <add>, %167, %cst_81 [1] : vector<16x32xf32> to vector<16xf32>
      %169 = vector.shape_cast %168 : vector<16xf32> to vector<16x1xf32>
      %cst_82 = arith.constant 3.200000e+01 : f32
      %170 = vector.broadcast %cst_82 : f32 to vector<16x1xf32>
      %171 = arith.divf %169, %170 : vector<16x1xf32>
      %172 = vector.broadcast %164 : vector<16x1xf32> to vector<16x32xf32>
      %173 = arith.subf %158, %172 : vector<16x32xf32>
      %cst_83 = arith.constant 9.99999996E-13 : f32
      %174 = vector.broadcast %cst_83 : f32 to vector<16x1xf32>
      %175 = arith.addf %171, %174 : vector<16x1xf32>
      %176 = math.rsqrt %175 : vector<16x1xf32>
      %177 = vector.broadcast %176 : vector<16x1xf32> to vector<16x32xf32>
      %178 = arith.mulf %173, %177 : vector<16x32xf32>
      %179 = vector.broadcast %159 : vector<1x32xf32> to vector<16x32xf32>
      %180 = arith.mulf %178, %179 : vector<16x32xf32>
      %181 = vector.broadcast %160 : vector<1x32xf32> to vector<16x32xf32>
      %182 = arith.addf %180, %181 : vector<16x32xf32>
      %c0_84 = arith.constant 0 : index
      %c0_85 = arith.constant 0 : index
      %183 = vector.load %arg23[%c0_84, %c0_85] : memref<16x32xf32, #tpu.memory_space<vmem>>, vector<16x32xf32>
      tpu.vector_store %arg23[%c0_84, %c0_85], %182 {strides = array<i32>} : memref<16x32xf32, #tpu.memory_space<vmem>>, vector<16x32xf32>,
    } else {
    }
    %c0 = arith.constant 0 : index
    %c0_1 = arith.constant 0 : index
    %3 = vector.load %arg23[%c0, %c0_1] : memref<16x32xf32, #tpu.memory_space<vmem>>, vector<16x32xf32>
    %c0_2 = arith.constant 0 : index
    %c0_3 = arith.constant 0 : index
    %c0_4 = arith.constant 0 : index
    %4 = vector.load %arg7[%c0_2, %c0_3, %c0_4] : memref<1x32x96xf32, #tpu.memory_space<vmem>>, vector<1x32x96xf32>
    %5 = vector.shape_cast %4 : vector<1x32x96xf32> to vector<32x96xf32>
    %cst = arith.constant dense<0.000000e+00> : vector<16x96xf32>
    %6 = tpu.matmul %3, %5, %cst {dimension_numbers = #tpu.dot_dimension_numbers<[1], [0], [0], [1], [0, 0, 1, 1], [], []>} : vector<16x32xf32>, vector<32x96xf32>, vector<16x96xf32> -> vector<16x96xf32>
    %c0_5 = arith.constant 0 : index
    %c0_6 = arith.constant 0 : index
    %c0_7 = arith.constant 0 : index
    %7 = vector.load %arg8[%c0_5, %c0_6, %c0_7] : memref<1x1x96xf32, #tpu.memory_space<vmem>>, vector<1x1x96xf32>
    %8 = vector.shape_cast %7 : vector<1x1x96xf32> to vector<1x96xf32>
    %9 = vector.broadcast %8 : vector<1x96xf32> to vector<16x96xf32>
    %10 = arith.addf %6, %9 : vector<16x96xf32>
    %c0_8 = arith.constant 0 : index
    %c0_9 = arith.constant 0 : index
    %c0_10 = arith.constant 0 : index
    %11 = vector.load %arg2[%c0_8, %c0_9, %c0_10] : memref<2x1x8xf32, #tpu.memory_space<vmem>>, vector<2x1x8xf32>
    %c0_11 = arith.constant 0 : index
    %c0_12 = arith.constant 0 : index
    %c0_13 = arith.constant 0 : index
    %12 = vector.load %arg9[%c0_11, %c0_12, %c0_13] : memref<1x32x32xf32, #tpu.memory_space<vmem>>, vector<1x32x32xf32>
    %13 = vector.shape_cast %12 : vector<1x32x32xf32> to vector<32x32xf32>
    %cst_14 = arith.constant 0.000000e+00 : f32
    %14 = vector.broadcast %cst_14 : f32 to vector<16x32xf32>
    %15 = vector.extract_strided_slice %10 {offsets = [0, 0], sizes = [16, 16], strides = [1, 1]} : vector<16x96xf32> to vector<16x16xf32>
    %16 = vector.shape_cast %15 : vector<16x16xf32> to vector<2x8x16xf32>
    %17 = vector.extract_strided_slice %10 {offsets = [0, 32], sizes = [16, 16], strides = [1, 1]} : vector<16x96xf32> to vector<16x16xf32>
    %18 = vector.shape_cast %17 : vector<16x16xf32> to vector<2x8x16xf32>
    %19 = vector.extract_strided_slice %10 {offsets = [0, 64], sizes = [16, 16], strides = [1, 1]} : vector<16x96xf32> to vector<16x16xf32>
    %20 = vector.shape_cast %19 : vector<16x16xf32> to vector<2x8x16xf32>
    "tpu.trace_start"() <{level = 10 : i32, message = "bqd,bkd->bqk"}> : () -> ()
    %cst_15 = arith.constant dense<0.000000e+00> : vector<2x8x8xf32>
    %21 = tpu.matmul %16, %18, %cst_15 {dimension_numbers = #tpu.dot_dimension_numbers<[2], [2], [1], [1], [0, 0, 0, 1, 1, 1], [0], [0]>} : vector<2x8x16xf32>, vector<2x8x16xf32>, vector<2x8x8xf32> -> vector<2x8x8xf32>
    "tpu.trace_stop"() : () -> ()
    %cst_16 = arith.constant 2.500000e-01 : f32
    %22 = vector.broadcast %cst_16 : f32 to vector<2x8x8xf32>
    %23 = arith.mulf %21, %22 : vector<2x8x8xf32>
    %24 = vector.broadcast %11 : vector<2x1x8xf32> to vector<2x8x8xf32>
    %25 = arith.addf %23, %24 : vector<2x8x8xf32>
    %cst_17 = arith.constant dense<0xFF800000> : vector<2x8xf32>
    %26 = vector.multi_reduction <maximumf>, %25, %cst_17 [2] : vector<2x8x8xf32> to vector<2x8xf32>
    %27 = vector.shape_cast %26 : vector<2x8xf32> to vector<2x8x1xf32>
    %28 = vector.broadcast %27 : vector<2x8x1xf32> to vector<2x8x8xf32>
    %29 = arith.subf %25, %28 : vector<2x8x8xf32>
    %30 = math.exp %29 : vector<2x8x8xf32>
    %cst_18 = arith.constant dense<0.000000e+00> : vector<2x8xf32>
    %31 = vector.multi_reduction <add>, %30, %cst_18 [2] : vector<2x8x8xf32> to vector<2x8xf32>
    %32 = vector.shape_cast %31 : vector<2x8xf32> to vector<2x8x1xf32>
    %33 = tpu.reciprocal %32 {approx = true} : vector<2x8x1xf32> -> vector<2x8x1xf32>
    %34 = vector.broadcast %33 : vector<2x8x1xf32> to vector<2x8x8xf32>
    %35 = arith.mulf %30, %34 : vector<2x8x8xf32>
    "tpu.trace_start"() <{level = 10 : i32, message = "bqk,bkd->bqd"}> : () -> ()
    %cst_19 = arith.constant dense<0.000000e+00> : vector<2x8x16xf32>
    %36 = tpu.matmul %35, %20, %cst_19 {dimension_numbers = #tpu.dot_dimension_numbers<[2], [1], [1], [2], [0, 0, 0, 1, 1, 2], [0], [0]>} : vector<2x8x8xf32>, vector<2x8x16xf32>, vector<2x8x16xf32> -> vector<2x8x16xf32>
    "tpu.trace_stop"() : () -> ()
    %37 = vector.shape_cast %36 : vector<2x8x16xf32> to vector<16x16xf32>
    %38 = vector.extract_strided_slice %13 {offsets = [0, 0], sizes = [16, 32], strides = [1, 1]} : vector<32x32xf32> to vector<16x32xf32>
    %cst_20 = arith.constant dense<0.000000e+00> : vector<16x32xf32>
    %39 = tpu.matmul %37, %38, %cst_20 {dimension_numbers = #tpu.dot_dimension_numbers<[1], [0], [0], [1], [0, 0, 1, 1], [], []>} : vector<16x16xf32>, vector<16x32xf32>, vector<16x32xf32> -> vector<16x32xf32>
    %40 = arith.addf %14, %39 : vector<16x32xf32>
    %41 = vector.extract_strided_slice %10 {offsets = [0, 16], sizes = [16, 16], strides = [1, 1]} : vector<16x96xf32> to vector<16x16xf32>
    %42 = vector.shape_cast %41 : vector<16x16xf32> to vector<2x8x16xf32>
    %43 = vector.extract_strided_slice %10 {offsets = [0, 48], sizes = [16, 16], strides = [1, 1]} : vector<16x96xf32> to vector<16x16xf32>
    %44 = vector.shape_cast %43 : vector<16x16xf32> to vector<2x8x16xf32>
    %45 = vector.extract_strided_slice %10 {offsets = [0, 80], sizes = [16, 16], strides = [1, 1]} : vector<16x96xf32> to vector<16x16xf32>
    %46 = vector.shape_cast %45 : vector<16x16xf32> to vector<2x8x16xf32>
    "tpu.trace_start"() <{level = 10 : i32, message = "bqd,bkd->bqk"}> : () -> ()
    %cst_21 = arith.constant dense<0.000000e+00> : vector<2x8x8xf32>
    %47 = tpu.matmul %42, %44, %cst_21 {dimension_numbers = #tpu.dot_dimension_numbers<[2], [2], [1], [1], [0, 0, 0, 1, 1, 1], [0], [0]>} : vector<2x8x16xf32>, vector<2x8x16xf32>, vector<2x8x8xf32> -> vector<2x8x8xf32>
    "tpu.trace_stop"() : () -> ()
    %cst_22 = arith.constant 2.500000e-01 : f32
    %48 = vector.broadcast %cst_22 : f32 to vector<2x8x8xf32>
    %49 = arith.mulf %47, %48 : vector<2x8x8xf32>
    %50 = vector.broadcast %11 : vector<2x1x8xf32> to vector<2x8x8xf32>
    %51 = arith.addf %49, %50 : vector<2x8x8xf32>
    %cst_23 = arith.constant dense<0xFF800000> : vector<2x8xf32>
    %52 = vector.multi_reduction <maximumf>, %51, %cst_23 [2] : vector<2x8x8xf32> to vector<2x8xf32>
    %53 = vector.shape_cast %52 : vector<2x8xf32> to vector<2x8x1xf32>
    %54 = vector.broadcast %53 : vector<2x8x1xf32> to vector<2x8x8xf32>
    %55 = arith.subf %51, %54 : vector<2x8x8xf32>
    %56 = math.exp %55 : vector<2x8x8xf32>
    %cst_24 = arith.constant dense<0.000000e+00> : vector<2x8xf32>
    %57 = vector.multi_reduction <add>, %56, %cst_24 [2] : vector<2x8x8xf32> to vector<2x8xf32>
    %58 = vector.shape_cast %57 : vector<2x8xf32> to vector<2x8x1xf32>
    %59 = tpu.reciprocal %58 {approx = true} : vector<2x8x1xf32> -> vector<2x8x1xf32>
    %60 = vector.broadcast %59 : vector<2x8x1xf32> to vector<2x8x8xf32>
    %61 = arith.mulf %56, %60 : vector<2x8x8xf32>
    "tpu.trace_start"() <{level = 10 : i32, message = "bqk,bkd->bqd"}> : () -> ()
    %cst_25 = arith.constant dense<0.000000e+00> : vector<2x8x16xf32>
    %62 = tpu.matmul %61, %46, %cst_25 {dimension_numbers = #tpu.dot_dimension_numbers<[2], [1], [1], [2], [0, 0, 0, 1, 1, 2], [0], [0]>} : vector<2x8x8xf32>, vector<2x8x16xf32>, vector<2x8x16xf32> -> vector<2x8x16xf32>
    "tpu.trace_stop"() : () -> ()
    %63 = vector.shape_cast %62 : vector<2x8x16xf32> to vector<16x16xf32>
    %64 = vector.extract_strided_slice %13 {offsets = [16, 0], sizes = [16, 32], strides = [1, 1]} : vector<32x32xf32> to vector<16x32xf32>
    %cst_26 = arith.constant dense<0.000000e+00> : vector<16x32xf32>
    %65 = tpu.matmul %63, %64, %cst_26 {dimension_numbers = #tpu.dot_dimension_numbers<[1], [0], [0], [1], [0, 0, 1, 1], [], []>} : vector<16x16xf32>, vector<16x32xf32>, vector<16x32xf32> -> vector<16x32xf32>
    %66 = arith.addf %40, %65 : vector<16x32xf32>
    %c0_27 = arith.constant 0 : index
    %c0_28 = arith.constant 0 : index
    %c0_29 = arith.constant 0 : index
    %67 = vector.load %arg10[%c0_27, %c0_28, %c0_29] : memref<1x1x32xf32, #tpu.memory_space<vmem>>, vector<1x1x32xf32>
    %68 = vector.shape_cast %67 : vector<1x1x32xf32> to vector<1x32xf32>
    %69 = vector.broadcast %68 : vector<1x32xf32> to vector<16x32xf32>
    %70 = arith.addf %66, %69 : vector<16x32xf32>
    %71 = arith.addf %3, %70 : vector<16x32xf32>
    %c0_30 = arith.constant 0 : index
    %c0_31 = arith.constant 0 : index
    %c0_32 = arith.constant 0 : index
    %72 = vector.load %arg11[%c0_30, %c0_31, %c0_32] : memref<1x1x32xf32, #tpu.memory_space<vmem>>, vector<1x1x32xf32>
    %73 = vector.shape_cast %72 : vector<1x1x32xf32> to vector<1x32xf32>
    %c0_33 = arith.constant 0 : index
    %c0_34 = arith.constant 0 : index
    %c0_35 = arith.constant 0 : index
    %74 = vector.load %arg12[%c0_33, %c0_34, %c0_35] : memref<1x1x32xf32, #tpu.memory_space<vmem>>, vector<1x1x32xf32>
    %75 = vector.shape_cast %74 : vector<1x1x32xf32> to vector<1x32xf32>
    %cst_36 = arith.constant dense<0.000000e+00> : vector<16xf32>
    %76 = vector.multi_reduction <add>, %71, %cst_36 [1] : vector<16x32xf32> to vector<16xf32>
    %77 = vector.shape_cast %76 : vector<16xf32> to vector<16x1xf32>
    %cst_37 = arith.constant 3.200000e+01 : f32
    %78 = vector.broadcast %cst_37 : f32 to vector<16x1xf32>
    %79 = arith.divf %77, %78 : vector<16x1xf32>
    %80 = vector.broadcast %79 : vector<16x1xf32> to vector<16x32xf32>
    %81 = arith.subf %71, %80 : vector<16x32xf32>
    %82 = arith.mulf %81, %81 : vector<16x32xf32>
    %cst_38 = arith.constant dense<0.000000e+00> : vector<16xf32>
    %83 = vector.multi_reduction <add>, %82, %cst_38 [1] : vector<16x32xf32> to vector<16xf32>
    %84 = vector.shape_cast %83 : vector<16xf32> to vector<16x1xf32>
    %cst_39 = arith.constant 3.200000e+01 : f32
    %85 = vector.broadcast %cst_39 : f32 to vector<16x1xf32>
    %86 = arith.divf %84, %85 : vector<16x1xf32>
    %87 = vector.broadcast %79 : vector<16x1xf32> to vector<16x32xf32>
    %88 = arith.subf %71, %87 : vector<16x32xf32>
    %cst_40 = arith.constant 9.99999996E-13 : f32
    %89 = vector.broadcast %cst_40 : f32 to vector<16x1xf32>
    %90 = arith.addf %86, %89 : vector<16x1xf32>
    %91 = math.rsqrt %90 : vector<16x1xf32>
    %92 = vector.broadcast %91 : vector<16x1xf32> to vector<16x32xf32>
    %93 = arith.mulf %88, %92 : vector<16x32xf32>
    %94 = vector.broadcast %73 : vector<1x32xf32> to vector<16x32xf32>
    %95 = arith.mulf %93, %94 : vector<16x32xf32>
    %96 = vector.broadcast %75 : vector<1x32xf32> to vector<16x32xf32>
    %97 = arith.addf %95, %96 : vector<16x32xf32>
    %c0_41 = arith.constant 0 : index
    %c0_42 = arith.constant 0 : index
    %c0_43 = arith.constant 0 : index
    %98 = vector.load %arg13[%c0_41, %c0_42, %c0_43] : memref<1x32x64xf32, #tpu.memory_space<vmem>>, vector<1x32x64xf32>
    %99 = vector.shape_cast %98 : vector<1x32x64xf32> to vector<32x64xf32>
    %cst_44 = arith.constant dense<0.000000e+00> : vector<16x64xf32>
    %100 = tpu.matmul %97, %99, %cst_44 {dimension_numbers = #tpu.dot_dimension_numbers<[1], [0], [0], [1], [0, 0, 1, 1], [], []>} : vector<16x32xf32>, vector<32x64xf32>, vector<16x64xf32> -> vector<16x64xf32>
    %c0_45 = arith.constant 0 : index
    %c0_46 = arith.constant 0 : index
    %c0_47 = arith.constant 0 : index
    %101 = vector.load %arg14[%c0_45, %c0_46, %c0_47] : memref<1x1x64xf32, #tpu.memory_space<vmem>>, vector<1x1x64xf32>
    %102 = vector.shape_cast %101 : vector<1x1x64xf32> to vector<1x64xf32>
    %103 = vector.broadcast %102 : vector<1x64xf32> to vector<16x64xf32>
    %104 = arith.addf %100, %103 : vector<16x64xf32>
    %105 = arith.mulf %104, %104 : vector<16x64xf32>
    %106 = arith.mulf %104, %105 : vector<16x64xf32>
    %cst_48 = arith.constant 4.471500e-02 : f32
    %107 = vector.broadcast %cst_48 : f32 to vector<16x64xf32>
    %108 = arith.mulf %107, %106 : vector<16x64xf32>
    %109 = arith.addf %104, %108 : vector<16x64xf32>
    %cst_49 = arith.constant 0.797884583 : f32
    %110 = vector.broadcast %cst_49 : f32 to vector<16x64xf32>
    %111 = arith.mulf %110, %109 : vector<16x64xf32>
    %112 = math.tanh %111 : vector<16x64xf32>
    %cst_50 = arith.constant 1.000000e+00 : f32
    %113 = vector.broadcast %cst_50 : f32 to vector<16x64xf32>
    %114 = arith.addf %113, %112 : vector<16x64xf32>
    %cst_51 = arith.constant 5.000000e-01 : f32
    %115 = vector.broadcast %cst_51 : f32 to vector<16x64xf32>
    %116 = arith.mulf %115, %114 : vector<16x64xf32>
    %117 = arith.mulf %104, %116 : vector<16x64xf32>
    %c0_52 = arith.constant 0 : index
    %c0_53 = arith.constant 0 : index
    %c0_54 = arith.constant 0 : index
    %118 = vector.load %arg15[%c0_52, %c0_53, %c0_54] : memref<1x64x32xf32, #tpu.memory_space<vmem>>, vector<1x64x32xf32>
    %119 = vector.shape_cast %118 : vector<1x64x32xf32> to vector<64x32xf32>
    %cst_55 = arith.constant dense<0.000000e+00> : vector<16x32xf32>
    %120 = tpu.matmul %117, %119, %cst_55 {dimension_numbers = #tpu.dot_dimension_numbers<[1], [0], [0], [1], [0, 0, 1, 1], [], []>} : vector<16x64xf32>, vector<64x32xf32>, vector<16x32xf32> -> vector<16x32xf32>
    %c0_56 = arith.constant 0 : index
    %c0_57 = arith.constant 0 : index
    %c0_58 = arith.constant 0 : index
    %121 = vector.load %arg16[%c0_56, %c0_57, %c0_58] : memref<1x1x32xf32, #tpu.memory_space<vmem>>, vector<1x1x32xf32>
    %122 = vector.shape_cast %121 : vector<1x1x32xf32> to vector<1x32xf32>
    %123 = vector.broadcast %122 : vector<1x32xf32> to vector<16x32xf32>
    %124 = arith.addf %120, %123 : vector<16x32xf32>
    %125 = arith.addf %97, %124 : vector<16x32xf32>
    %c0_59 = arith.constant 0 : index
    %c0_60 = arith.constant 0 : index
    %c0_61 = arith.constant 0 : index
    %126 = vector.load %arg17[%c0_59, %c0_60, %c0_61] : memref<1x1x32xf32, #tpu.memory_space<vmem>>, vector<1x1x32xf32>
    %127 = vector.shape_cast %126 : vector<1x1x32xf32> to vector<1x32xf32>
    %c0_62 = arith.constant 0 : index
    %c0_63 = arith.constant 0 : index
    %c0_64 = arith.constant 0 : index
    %128 = vector.load %arg18[%c0_62, %c0_63, %c0_64] : memref<1x1x32xf32, #tpu.memory_space<vmem>>, vector<1x1x32xf32>
    %129 = vector.shape_cast %128 : vector<1x1x32xf32> to vector<1x32xf32>
    %cst_65 = arith.constant dense<0.000000e+00> : vector<16xf32>
    %130 = vector.multi_reduction <add>, %125, %cst_65 [1] : vector<16x32xf32> to vector<16xf32>
    %131 = vector.shape_cast %130 : vector<16xf32> to vector<16x1xf32>
    %cst_66 = arith.constant 3.200000e+01 : f32
    %132 = vector.broadcast %cst_66 : f32 to vector<16x1xf32>
    %133 = arith.divf %131, %132 : vector<16x1xf32>
    %134 = vector.broadcast %133 : vector<16x1xf32> to vector<16x32xf32>
    %135 = arith.subf %125, %134 : vector<16x32xf32>
    %136 = arith.mulf %135, %135 : vector<16x32xf32>
    %cst_67 = arith.constant dense<0.000000e+00> : vector<16xf32>
    %137 = vector.multi_reduction <add>, %136, %cst_67 [1] : vector<16x32xf32> to vector<16xf32>
    %138 = vector.shape_cast %137 : vector<16xf32> to vector<16x1xf32>
    %cst_68 = arith.constant 3.200000e+01 : f32
    %139 = vector.broadcast %cst_68 : f32 to vector<16x1xf32>
    %140 = arith.divf %138, %139 : vector<16x1xf32>
    %141 = vector.broadcast %133 : vector<16x1xf32> to vector<16x32xf32>
    %142 = arith.subf %125, %141 : vector<16x32xf32>
    %cst_69 = arith.constant 9.99999996E-13 : f32
    %143 = vector.broadcast %cst_69 : f32 to vector<16x1xf32>
    %144 = arith.addf %140, %143 : vector<16x1xf32>
    %145 = math.rsqrt %144 : vector<16x1xf32>
    %146 = vector.broadcast %145 : vector<16x1xf32> to vector<16x32xf32>
    %147 = arith.mulf %142, %146 : vector<16x32xf32>
    %148 = vector.broadcast %127 : vector<1x32xf32> to vector<16x32xf32>
    %149 = arith.mulf %147, %148 : vector<16x32xf32>
    %150 = vector.broadcast %129 : vector<1x32xf32> to vector<16x32xf32>
    %151 = arith.addf %149, %150 : vector<16x32xf32>
    %c1_i32 = arith.constant 1 : i32
    %152 = arith.cmpi slt, %arg0, %c1_i32 : i32
    %153 = arith.extui %152 : i1 to i32
    %c0_i32_70 = arith.constant 0 : i32
    %154 = arith.cmpi ne, %153, %c0_i32_70 : i32
    scf.if %154 {
      %c0_73 = arith.constant 0 : index
      %c0_74 = arith.constant 0 : index
      %158 = vector.load %arg23[%c0_73, %c0_74] : memref<16x32xf32, #tpu.memory_space<vmem>>, vector<16x32xf32>
      tpu.vector_store %arg23[%c0_73, %c0_74], %151 {strides = array<i32>} : memref<16x32xf32, #tpu.memory_space<vmem>>, vector<16x32xf32>,
    } else {
    }
    %c1_i32_71 = arith.constant 1 : i32
    %155 = arith.cmpi eq, %arg0, %c1_i32_71 : i32
    %156 = arith.extui %155 : i1 to i32
    %c0_i32_72 = arith.constant 0 : i32
    %157 = arith.cmpi ne, %156, %c0_i32_72 : i32
    scf.if %157 {
      %c0_73 = arith.constant 0 : index
      %c0_74 = arith.constant 0 : index
      %158 = vector.load %arg19[%c0_73, %c0_74] : memref<32x128xf32, #tpu.memory_space<vmem>>, vector<32x128xf32>
      %cst_75 = arith.constant dense<0.000000e+00> : vector<16x128xf32>
      %159 = tpu.matmul %151, %158, %cst_75 {dimension_numbers = #tpu.dot_dimension_numbers<[1], [0], [0], [1], [0, 0, 1, 1], [], []>} : vector<16x32xf32>, vector<32x128xf32>, vector<16x128xf32> -> vector<16x128xf32>
      %c0_76 = arith.constant 0 : index
      %c0_77 = arith.constant 0 : index
      %160 = vector.load %arg20[%c0_76, %c0_77] : memref<1x128xf32, #tpu.memory_space<vmem>>, vector<1x128xf32>
      %161 = vector.broadcast %160 : vector<1x128xf32> to vector<16x128xf32>
      %162 = arith.addf %159, %161 : vector<16x128xf32>
      %c0_78 = arith.constant 0 : index
      %c0_79 = arith.constant 0 : index
      %163 = vector.load %arg21[%c0_78, %c0_79] : memref<16x128xf32, #tpu.memory_space<vmem>>, vector<16x128xf32>
      tpu.vector_store %arg21[%c0_78, %c0_79], %162 {strides = array<i32>} : memref<16x128xf32, #tpu.memory_space<vmem>>, vector<16x128xf32>,
      %164 = tpu.iota {dimensions = array<i32: 1>} : vector<16x128xi32>
      %c5_i32 = arith.constant 5 : i32
      %165 = vector.broadcast %c5_i32 : i32 to vector<16x128xi32>
      %166 = arith.cmpi slt, %164, %165 : vector<16x128xi32>
      %cst_80 = arith.constant -1.000000e+30 : f32
      %167 = vector.broadcast %cst_80 : f32 to vector<16x128xf32>
      %168 = arith.select %166, %162, %167 : vector<16x128xi1>, vector<16x128xf32>
      %cst_81 = arith.constant dense<0xFF800000> : vector<16xf32>
      %169 = vector.multi_reduction <maximumf>, %168, %cst_81 [1] : vector<16x128xf32> to vector<16xf32>
      %170 = vector.shape_cast %169 : vector<16xf32> to vector<16x1xf32>
      %171 = vector.broadcast %170 : vector<16x1xf32> to vector<16x128xf32>
      %172 = arith.subf %168, %171 : vector<16x128xf32>
      %173 = math.exp %172 : vector<16x128xf32>
      %cst_82 = arith.constant dense<0.000000e+00> : vector<16xf32>
      %174 = vector.multi_reduction <add>, %173, %cst_82 [1] : vector<16x128xf32> to vector<16xf32>
      %175 = vector.shape_cast %174 : vector<16xf32> to vector<16x1xf32>
      %176 = math.log %175 : vector<16x1xf32>
      %177 = arith.addf %176, %170 : vector<16x1xf32>
      %c0_83 = arith.constant 0 : index
      %c0_84 = arith.constant 0 : index
      %178 = vector.load %arg4[%c0_83, %c0_84] : memref<16x1xi32, #tpu.memory_space<vmem>>, vector<16x1xi32>
      %179 = vector.broadcast %178 : vector<16x1xi32> to vector<16x128xi32>
      %180 = arith.cmpi eq, %164, %179 : vector<16x128xi32>
      %181 = arith.extui %180 : vector<16x128xi1> to vector<16x128xi32>
      %182 = arith.sitofp %181 : vector<16x128xi32> to vector<16x128xf32>
      %183 = arith.mulf %182, %162 : vector<16x128xf32>
      %cst_85 = arith.constant dense<0.000000e+00> : vector<16xf32>
      %184 = vector.multi_reduction <add>, %183, %cst_85 [1] : vector<16x128xf32> to vector<16xf32>
      %185 = vector.shape_cast %184 : vector<16xf32> to vector<16x1xf32>
      %186 = arith.subf %177, %185 : vector<16x1xf32>
      %c0_86 = arith.constant 0 : index
      %c0_87 = arith.constant 0 : index
      %187 = vector.load %arg3[%c0_86, %c0_87] : memref<16x1xf32, #tpu.memory_space<vmem>>, vector<16x1xf32>
      %188 = arith.mulf %186, %187 : vector<16x1xf32>
      %189 = vector.shape_cast %188 : vector<16x1xf32> to vector<1x16x1xf32>
      %cst_88 = arith.constant dense<0.000000e+00> : vector<1xf32>
      %190 = vector.multi_reduction <add>, %189, %cst_88 [1, 2] : vector<1x16x1xf32> to vector<1xf32>
      %191 = vector.shape_cast %190 : vector<1xf32> to vector<1x1x1xf32>
      %192 = vector.extract %191[0, 0, 0] : f32 from vector<1x1x1xf32>
      %193 = vector.shape_cast %187 : vector<16x1xf32> to vector<1x16x1xf32>
      %cst_89 = arith.constant dense<0.000000e+00> : vector<1xf32>
      %194 = vector.multi_reduction <add>, %193, %cst_89 [1, 2] : vector<1x16x1xf32> to vector<1xf32>
      %195 = vector.shape_cast %194 : vector<1xf32> to vector<1x1x1xf32>
      %196 = vector.extract %195[0, 0, 0] : f32 from vector<1x1x1xf32>
      %cst_90 = arith.constant 1.000000e+00 : f32
      %197 = arith.maximumf %196, %cst_90 : f32
      %198 = arith.divf %192, %197 : f32
      %c0_91 = arith.constant 0 : index
      %c0_92 = arith.constant 0 : index
      %199 = memref.load %arg22[%c0_91, %c0_92] : memref<1x1xf32, #tpu.memory_space<smem>>
      memref.store %198, %arg22[%c0_91, %c0_92] : memref<1x1xf32, #tpu.memory_space<smem>>
    } else {
    }
    return
  }
  func.func @transform_0(%arg0: i32) -> (i32, i32) {
    %c0_i32 = arith.constant 0 : i32
    %c0_i32_0 = arith.constant 0 : i32
    %c0_i32_1 = arith.constant 0 : i32
    return %c0_i32, %c0_i32_0 : i32, i32
  }
  func.func @transform_1(%arg0: i32) -> (i32, i32, i32) {
    %c0_i32 = arith.constant 0 : i32
    %c0_i32_0 = arith.constant 0 : i32
    %c0_i32_1 = arith.constant 0 : i32
    %c0_i32_2 = arith.constant 0 : i32
    return %c0_i32, %c0_i32_0, %c0_i32_1 : i32, i32, i32
  }
  func.func @transform_2(%arg0: i32) -> (i32, i32) {
    %c0_i32 = arith.constant 0 : i32
    %c0_i32_0 = arith.constant 0 : i32
    %c0_i32_1 = arith.constant 0 : i32
    return %c0_i32, %c0_i32_0 : i32, i32
  }
  func.func @transform_3(%arg0: i32) -> (i32, i32) {
    %c0_i32 = arith.constant 0 : i32
    %c0_i32_0 = arith.constant 0 : i32
    %c0_i32_1 = arith.constant 0 : i32
    return %c0_i32, %c0_i32_0 : i32, i32
  }
  func.func @transform_4(%arg0: i32) -> (i32, i32) {
    %c0_i32 = arith.constant 0 : i32
    %c0_i32_0 = arith.constant 0 : i32
    %c0_i32_1 = arith.constant 0 : i32
    return %c0_i32, %c0_i32_0 : i32, i32
  }
  func.func @transform_5(%arg0: i32) -> (i32, i32) {
    %c0_i32 = arith.constant 0 : i32
    %c0_i32_0 = arith.constant 0 : i32
    %c0_i32_1 = arith.constant 0 : i32
    return %c0_i32, %c0_i32_0 : i32, i32
  }
  func.func @transform_6(%arg0: i32) -> (i32, i32, i32) {
    %c0_i32 = arith.constant 0 : i32
    %c0_i32_0 = arith.constant 0 : i32
    %c0_i32_1 = arith.constant 0 : i32
    return %arg0, %c0_i32, %c0_i32_0 : i32, i32, i32
  }
  func.func @transform_7(%arg0: i32) -> (i32, i32, i32) {
    %c0_i32 = arith.constant 0 : i32
    %c0_i32_0 = arith.constant 0 : i32
    %c0_i32_1 = arith.constant 0 : i32
    return %arg0, %c0_i32, %c0_i32_0 : i32, i32, i32
  }
  func.func @transform_8(%arg0: i32) -> (i32, i32, i32) {
    %c0_i32 = arith.constant 0 : i32
    %c0_i32_0 = arith.constant 0 : i32
    %c0_i32_1 = arith.constant 0 : i32
    return %arg0, %c0_i32, %c0_i32_0 : i32, i32, i32
  }
  func.func @transform_9(%arg0: i32) -> (i32, i32, i32) {
    %c0_i32 = arith.constant 0 : i32
    %c0_i32_0 = arith.constant 0 : i32
    %c0_i32_1 = arith.constant 0 : i32
    return %arg0, %c0_i32, %c0_i32_0 : i32, i32, i32
  }
  func.func @transform_10(%arg0: i32) -> (i32, i32, i32) {
    %c0_i32 = arith.constant 0 : i32
    %c0_i32_0 = arith.constant 0 : i32
    %c0_i32_1 = arith.constant 0 : i32
    return %arg0, %c0_i32, %c0_i32_0 : i32, i32, i32
  }
  func.func @transform_11(%arg0: i32) -> (i32, i32, i32) {
    %c0_i32 = arith.constant 0 : i32
    %c0_i32_0 = arith.constant 0 : i32
    %c0_i32_1 = arith.constant 0 : i32
    return %arg0, %c0_i32, %c0_i32_0 : i32, i32, i32
  }
  func.func @transform_12(%arg0: i32) -> (i32, i32, i32) {
    %c0_i32 = arith.constant 0 : i32
    %c0_i32_0 = arith.constant 0 : i32
    %c0_i32_1 = arith.constant 0 : i32
    return %arg0, %c0_i32, %c0_i32_0 : i32, i32, i32
  }
  func.func @transform_13(%arg0: i32) -> (i32, i32, i32) {
    %c0_i32 = arith.constant 0 : i32
    %c0_i32_0 = arith.constant 0 : i32
    %c0_i32_1 = arith.constant 0 : i32
    return %arg0, %c0_i32, %c0_i32_0 : i32, i32, i32
  }
  func.func @transform_14(%arg0: i32) -> (i32, i32, i32) {
    %c0_i32 = arith.constant 0 : i32
    %c0_i32_0 = arith.constant 0 : i32
    %c0_i32_1 = arith.constant 0 : i32
    return %arg0, %c0_i32, %c0_i32_0 : i32, i32, i32
  }
  func.func @transform_15(%arg0: i32) -> (i32, i32, i32) {
    %c0_i32 = arith.constant 0 : i32
    %c0_i32_0 = arith.constant 0 : i32
    %c0_i32_1 = arith.constant 0 : i32
    return %arg0, %c0_i32, %c0_i32_0 : i32, i32, i32
  }
  func.func @transform_16(%arg0: i32) -> (i32, i32, i32) {
    %c0_i32 = arith.constant 0 : i32
    %c0_i32_0 = arith.constant 0 : i32
    %c0_i32_1 = arith.constant 0 : i32
    return %arg0, %c0_i32, %c0_i32_0 : i32, i32, i32
  }
  func.func @transform_17(%arg0: i32) -> (i32, i32, i32) {
    %c0_i32 = arith.constant 0 : i32
    %c0_i32_0 = arith.constant 0 : i32
    %c0_i32_1 = arith.constant 0 : i32
    return %arg0, %c0_i32, %c0_i32_0 : i32, i32, i32
  }
  func.func @transform_18(%arg0: i32) -> (i32, i32) {
    %c0_i32 = arith.constant 0 : i32
    %c0_i32_0 = arith.constant 0 : i32
    %c0_i32_1 = arith.constant 0 : i32
    return %c0_i32, %c0_i32_0 : i32, i32
  }
  func.func @transform_19(%arg0: i32) -> (i32, i32) {
    %c0_i32 = arith.constant 0 : i32
    %c0_i32_0 = arith.constant 0 : i32
    %c0_i32_1 = arith.constant 0 : i32
    return %c0_i32, %c0_i32_0 : i32, i32
  }
  func.func @transform_20(%arg0: i32) -> (i32, i32) {
    %c0_i32 = arith.constant 0 : i32
    %c0_i32_0 = arith.constant 0 : i32
    %c0_i32_1 = arith.constant 0 : i32
    return %c0_i32, %c0_i32_0 : i32, i32
  }
  func.func @transform_21(%arg0: i32) -> (i32, i32) {
    %c0_i32 = arith.constant 0 : i32
    %c0_i32_0 = arith.constant 0 : i32
    %c0_i32_1 = arith.constant 0 : i32
    return %c0_i32, %c0_i32_0 : i32, i32
  }
}

</mosaic_0001>

<bundles_post_ra>
// kernel: slot_bert_forward.1
= control target key start
LH: loop header
LB: loop body
LE: loop exit
PB: predicated region body
PF: predicated region fallthrough
CT: control target
= control target key end

     0   :  { %s3258_s0 = inlined_call_operand.vmem [shape: f32[16,32], index: 0, kind: input, shape index: {}]   ;;  %s3259_s1 = inlined_call_operand.vmem [shape: f32[2,1,8], index: 1, kind: input, shape index: {}]   ;;  %s3260_s2 = inlined_call_operand.vmem [shape: f32[16,1], index: 2, kind: input, shape index: {}]   ;;  %s3261_s3 = inlined_call_operand.vmem [shape: s32[16,1], index: 3, kind: input, shape index: {}]   ;;  %s3262_s4 = inlined_call_operand.vmem [shape: f32[1,32], index: 4, kind: input, shape index: {}]   ;;  %s3263_s5 = inlined_call_operand.vmem [shape: f32[1,32], index: 5, kind: input, shape index: {}]   ;;  %s3264_s6 = inlined_call_operand.vmem [shape: f32[2,32,96], index: 6, kind: input, shape index: {}]   ;;  %s3265_s7 = inlined_call_operand.vmem [shape: f32[2,1,96], index: 7, kind: input, shape index: {}]   ;;  %s3266_s8 = inlined_call_operand.vmem [shape: f32[2,32,32], index: 8, kind: input, shape index: {}]   ;;  %s3267_s9 = inlined_call_operand.vmem [shape: f32[2,1,32], index: 9, kind: input, shape index: {}]   ;;  %s3268_s10 = inlined_call_operand.vmem [shape: f32[2,1,32], index: 10, kind: input, shape index: {}]   ;;  %s3269_s11 = inlined_call_operand.vmem [shape: f32[2,1,32], index: 11, kind: input, shape index: {}]   ;;  %s3270_s12 = inlined_call_operand.vmem [shape: f32[2,32,64], index: 12, kind: input, shape index: {}]   ;;  %s3271_s13 = inlined_call_operand.vmem [shape: f32[2,1,64], index: 13, kind: input, shape index: {}]   ;;  %s3272_s14 = inlined_call_operand.vmem [shape: f32[2,64,32], index: 14, kind: input, shape index: {}]   ;;  %s3273_s15 = inlined_call_operand.vmem [shape: f32[2,1,32], index: 15, kind: input, shape index: {}]   ;;  %s3274_s16 = inlined_call_operand.vmem [shape: f32[2,1,32], index: 16, kind: input, shape index: {}]   ;;  %s3275_s17 = inlined_call_operand.vmem [shape: f32[2,1,32], index: 17, kind: input, shape index: {}]   ;;  %s3276_s18 = inlined_call_operand.vmem [shape: f32[32,128], index: 18, kind: input, shape index: {}]   ;;  %s3277_s19 = inlined_call_operand.vmem [shape: f32[1,128], index: 19, kind: input, shape index: {}]   ;;  %s3278_s20 = inlined_call_operand.vmem [shape: f32[16,128], index: 20, kind: output, shape index: {0}]   ;;  %s3279_s21 = inlined_call_operand.hbm [shape: f32[1,1], index: 21, kind: output, shape index: {1}]  }
   0x1   :  { %3288 = sst [smem:[#allocation7_spill]] %s3258_s0 }
   0x2   :  { %3289 = sst [smem:[#allocation8_spill]] %s3259_s1 }
   0x3   :  { %3290 = sst [smem:[#allocation9_spill]] %s3260_s2 }
   0x4   :  { %3291 = sst [smem:[#allocation10_spill]] %s3261_s3 }
   0x5   :  { %3292 = sst [smem:[#allocation11_spill]] %s3262_s4 }
   0x6   :  { %3293 = sst [smem:[#allocation12_spill]] %s3263_s5 }
   0x7   :  { %3294 = sst [smem:[#allocation13_spill]] %s3264_s6 }
   0x8   :  { %3295 = sst [smem:[#allocation14_spill]] %s3266_s8 }
   0x9   :  { %3296 = sst [smem:[#allocation15_spill]] %s3276_s18 }
   0xa   :  { %3297 = sst [smem:[#allocation16_spill]] %s3277_s19 }
   0xb   :  { %3298 = sst [smem:[#allocation17_spill]] %s3278_s20 }
   0xc   :  { %3299 = sst [smem:[#allocation18_spill]] %s3279_s21 }
   0xd   :  { %27 = vsyncpa [#allocation4], 0  ;;  %s2955_s2 = smov 0  }
   0xe LB: > { %3300 = sst [smem:[#allocation6_spill]] %s2832_s2  ;;  %s2961_s25 = sadd.s32 4294967295, %s2832_s2   ;;  %s2832_s2 = sphi %s2955_s2, %s33_s2  }
   0xf   : > { %p2468_p0 = scmp.ge.s32.totalorder %s2832_s2, 1  ;;  %p675_p1 = scmp.lt.s32.totalorder %s2832_s2, 3 }
  0x11   : > { %p676_p2 = pnand %p2468_p0, %p675_p1 }
  0x12   : > { %p769_p3 = scmp.lt.s32.totalorder (!%p676_p2), %s2961_s25, 1  ;;  %s3301_s6 = sld [smem:[#allocation13_spill]] (!%p676_p2) }
  0x13   : > { %679 = sbr.rel (%p676_p2) target bundleno = 4143 (0x102f), region = 100  ;;  %s3302_s8 = sld [smem:[#allocation14_spill]] (!%p676_p2) }
  0x14   : > { %p2477_p4 = scmp.ne.s32.totalorder (!%p676_p2), %s2961_s25, 0 }
  0x1a   : > { %s2967_s26 = scalar_select %p769_p3, %s2961_s25, 1 }
  0x1b   : > { %816 = sbr.rel (%p2477_p4) target bundleno = 352 (0x160), region = 104  ;;  %s3303_s1 = sld [smem:[#allocation7_spill]] (!%p2477_p4)  ;;  %vm821_vm0 = vcmask (!%p2477_p4), 261120  }
  0x1c   : > { %s2523_s27 = sshll.u32 %s2967_s26, 5  ;;  %s2526_s18 = sshll.u32 %s2967_s26, 6 }
  0x1d   : > { %s2977_s30 = scalar_lea.vmem %s3301_s6, %s2523_s27  ;;  %s2982_s23 = scalar_lea.vmem %s3302_s8, %s2523_s27 }
  0x1e   : > { %s2999_s6 = scalar_lea.vmem %s3270_s12, %s2523_s27  ;;  %s798_s8 = scalar_lea.vmem %s3271_s13, %s2967_s26 }
  0x1f   : > { %s3009_s2 = scalar_lea.vmem %s3272_s14, %s2526_s18  ;;  %s806_s3 = scalar_lea.vmem %s3273_s15, %s2967_s26 }
  0x20   : > { %s809_s0 = scalar_lea.vmem %s3274_s16, %s2967_s26  ;;  %s812_s19 = scalar_lea.vmem %s3275_s17, %s2967_s26 }
  0x21   : > { %v817_v0 = vld [vmem:[%s3303_s1] sm:$0xff] (!%p2477_p4)  ;;  %v818_v1 = vld [vmem:[%s3303_s1 + $0x8] sm:$0xff] (!%p2477_p4)  ;;  %s3304_s21 = sld [smem:[#allocation11_spill]] (!%p2477_p4)  ;;  %s3305_s4 = sld [smem:[#allocation12_spill]] (!%p2477_p4) }
  0x22   : > { %v822_v2 = vsel %vm821_vm0, %v817_v0, 0.0  ;;  %v825_v3 = vsel %vm821_vm0, %v818_v1, 0.0 }
  0x23   : > { %823 = vadd.xlane.f32.xlu0 %v822_v2 }
  0x27   : > { %826 = vadd.xlane.f32.xlu0 %v825_v3  ;;  %v2478_v21 = vld [vmem:[%s3304_s21] ss:$0 sm:$0xff] }
  0x28   : > { %v2479_v23 = vld [vmem:[%s3305_s4] ss:$0 sm:$0xff] }
  0xb0   : > { %v824_v4 = vpop.xlane.xlu0 %823 }
  0xb1   : > { %v829_v5 = vmul.f32 0.03125, %v824_v4 }
  0xb3   : > { %v831_v6 = vsub.f32 %v817_v0, %v829_v5 }
  0xb4   : > { %v827_v7 = vpop.xlane.xlu0 %826 }
  0xb5   : > { %v830_v8 = vmul.f32 0.03125, %v827_v7  ;;  %v833_v9 = vmul.f32 %v831_v6, %v831_v6 }
  0xb7   : > { %v832_v10 = vsub.f32 %v818_v1, %v830_v8  ;;  %v835_v11 = vsel %vm821_vm0, %v833_v9, 0.0 }
  0xb8   : > { %836 = vadd.xlane.f32.xlu1 %v835_v11 }
  0xb9   : > { %v834_v12 = vmul.f32 %v832_v10, %v832_v10 }
  0xbb   : > { %v838_v13 = vsel %vm821_vm0, %v834_v12, 0.0 }
  0xbc   : > { %839 = vadd.xlane.f32.xlu1 %v838_v13 }
 0x145   : > { %v837_v14 = vpop.xlane.xlu1 %836 }
 0x146   : > { %v841_v15 = vmul.f32 0.03125, %v837_v14 }
 0x148   : > { %v843_v16 = vadd.f32 1e-12, %v841_v15 }
 0x149   : > { %v840_v17 = vpop.xlane.xlu1 %839 }
 0x14a   : > { %2766 = vrsqrt.f32 %v843_v16  ;;  %v842_v18 = vmul.f32 0.03125, %v840_v17 }
 0x14c   : > { %v844_v19 = vadd.f32 1e-12, %v842_v18 }
 0x14e   : > { %2768 = vrsqrt.f32 %v844_v19 }
 0x154   : > { %v2767_v20 = vpop.eup %2766 }
 0x155   : > { %v847_v22 = vmul.f32 %v2767_v20, %v831_v6 }
 0x157   : > { %v855_v24 = vmul.f32 %v2478_v21, %v847_v22 }
 0x158   : > { %v2769_v25 = vpop.eup %2768 }
 0x159   : > { %v863_v26 = vadd.f32 %v2479_v23, %v855_v24  ;;  %v848_v27 = vmul.f32 %v2769_v25, %v832_v10 }
 0x15b   : > { %865 = vst.msk [vmem:[#allocation2] sm:$0xff] %vm821_vm0, %v863_v26  ;;  %v856_v28 = vmul.f32 %v2478_v21, %v848_v27 }
 0x15d   : > { %v864_v29 = vadd.f32 %v2479_v23, %v856_v28 }
 0x15f   : > { %866 = vst.msk [vmem:[#allocation2 + $0x8] sm:$0xff] %vm821_vm0, %v864_v29 }
 0x160 PF: > { %v869_v30 = vld [vmem:[%s2977_s30] sm:$0xff]  ;;  %v870_v31 = vld [vmem:[%s2977_s30 + $0x8] sm:$0xff]  ;;  %v871_v32 = vld [vmem:[%s2977_s30 + $0x10] sm:$0xff]  ;;  %vm880_vm1 = vcmask 261120   ;;  %v2834_v38 = vmov 0.0   ;;  %vm2835_vm2 = vmmov 0   ;;  %s3306_s22 = scalar_lea.vmem %s3265_s7, %s2967_s26 }
 0x161   : > { %v2685_v33 = vpack.c.bf16 %v870_v31, %v869_v30  ;;  %v872_v34 = vld [vmem:[%s2977_s30 + $0x18] sm:$0xff]  ;;  %2600 = vmatprep.subr.mxu0 %v2834_v38  ;;  %2602 = vmatprep.mubr.msk.f32.mxu0 %vm2835_vm2, %v2834_v38  ;;  %v2480_v39 = vld [vmem:[%s3306_s22] ss:$0 sm:$0xff]  ;;  %s2836_s18 = smov 96   ;;  %vm971_vm3 = vcmask 130048   ;;  %s3307_s20 = sld [smem:[#allocation8_spill]] }
 0x162   : > { %v3046_v35 = vld [vmem:[#allocation2] sm:$0xff]  ;;  %v2689_v36 = vpack.c.bf16 %v872_v34, %v871_v32  ;;  %vm1139_vm4 = vcmask 64512   ;;  %s2837_s27 = smov 64   ;;  %s2838_s4 = smov 80   ;;  %vm1991_vm5 = vcmask 523264  }
 0x163   : > { %2587 = vmatprep.mubr.msk.f32.mxu1 %vm880_vm1, %v3046_v35  ;;  %2686 = vmatprep.subr.bf16.mxu1 %v2685_v33  ;;  %s2839_s30 = smov 112   ;;  %s2840_s5 = smov 48  }
 0x164   : > { %2688 = vmatpush3.bf16.msra.mxu1 %v2685_v33  ;;  %p2512_p5 = scmp.ge.s32.totalorder %s2961_s25, 1 }
 0x165   : > { %2690 = vmatprep.subr.bf16.mxu1 %v2689_v36 }
 0x166   : > { %v3050_v37 = vld [vmem:[#allocation2 + $0x8] sm:$0xff] }
 0x167   : > { %v3086_v47 = vld [vmem:[%s3307_s20] ss:$0 sm:$0xff]  ;;  %v3092_v52 = vld [vmem:[%s3307_s20 + $0x1] ss:$0 sm:$0xff] }
 0x168   : > { %2692 = vmatpush3.bf16.msra.mxu1 %v2689_v36 }
 0x169   : > { %2590 = vmatprep.subr.mxu1 %v2834_v38 }
 0x16b   : > { %2588 = vmatmul.mubr.msk.f32.vlgmr.msra.gmra.mrb[0].mxu1 %vm880_vm1, %v3050_v37 }
 0x16c   : > { %2592 = vmatprep.mubr.msk.f32.mxu1 %vm2835_vm2, %v2834_v38 }
 0x23e   : > { %v2589_v40 = vpop.f32.mrb[0].mxu1 }
 0x23f   : > { %v953_v41 = vpop.f32.mrb[1].mxu1  ;;  %v3068_v43 = vadd.f32 %v2589_v40, %v2480_v39 }
 0x240   : > { %v3065_v42 = vadd.f32 %v2480_v39, %v953_v41 }
 0x242   : > { %969 = vrot.lane.b32.xlu0 %v3065_v42, %s2836_s18 }
 0x246   : > { %1047 = vrot.lane.b32.xlu0 %v3068_v43, %s2836_s18 }
 0x2b4   : > { %v970_v44 = vpop.permute.xlu0 %969 }
 0x2b5   : > { %2591 = vmatpush3.xpose.msk.msra.mxu1 %vm971_vm3, %v970_v44 }
 0x2b6   : > { %2595 = vmatprep.subr.mxu1 %v2834_v38 }
 0x2b8   : > { %2593 = vmatmul.mubr.msk.f32.vlgmr.msra.gmra.mrb[2].mxu1 %vm971_vm3, %v3065_v42  ;;  %v1048_v45 = vpop.permute.xlu0 %1047 }
 0x2b9   : > { %2596 = vmatpush3.xpose.msk.msra.mxu1 %vm971_vm3, %v1048_v45  ;;  %2597 = vmatprep.mubr.msk.f32.mxu1 %vm2835_vm2, %v2834_v38 }
 0x2ba   : > { %2605 = vmatprep.subr.mxu1 %v2834_v38 }
 0x2bc   : > { %2598 = vmatmul.mubr.msk.f32.vlgmr.msra.gmra.mrb[4].mxu1 %vm971_vm3, %v3068_v43 }
 0x2bd   : > { %2607 = vmatprep.mubr.msk.f32.mxu1 %vm2835_vm2, %v2834_v38 }
 0x38b   : > { %v1042_v46 = vpop.f32.mrb[2].mxu1 }
 0x38c   : > { %v1123_v48 = vmul.f32 0.25, %v1042_v46  ;;  %v2594_v49 = vpop.f32.mrb[3].mxu1 }
 0x38e   : > { %v1137_v50 = vadd.f32 %v3086_v47, %v1123_v48 }
 0x38f   : > { %v1119_v51 = vpop.f32.mrb[4].mxu1 }
 0x390   : > { %v1124_v53 = vmul.f32 0.25, %v1119_v51  ;;  %v2599_v54 = vpop.f32.mrb[5].mxu1  ;;  %v1140_v55 = vsel %vm1139_vm4, %v1137_v50, -inf  ;;  %v966_v51 = vld [vmem:[%s2982_s23 + $0x10] sm:$0xff] }
 0x391   : > { %1141 = vmax.xlane.f32.xlu1 %v1140_v55  ;;  %v965_v54 = vld [vmem:[%s2982_s23 + $0x8] sm:$0xff] }
 0x392   : > { %v1138_v56 = vadd.f32 %v3092_v52, %v1124_v53 }
 0x394   : > { %v1143_v57 = vsel %vm1139_vm4, %v1138_v56, -inf }
 0x395   : > { %1144 = vmax.xlane.f32.xlu1 %v1143_v57 }
 0x3a6   : > { %1162 = vrot.lane.b32.xlu1 %v3065_v42, %s2837_s27 }
 0x3aa   : > { %1238 = vrot.lane.b32.xlu1 %v3068_v43, %s2837_s27  ;;  %s3310_s27 = scalar_lea.vmem %s3269_s11, %s2967_s26 }
 0x3ae   : > { %1316 = vrot.lane.b32.xlu1 %v3065_v42, %s2838_s4 }
 0x3b2   : > { %1394 = vrot.lane.b32.xlu1 %v3068_v43, %s2838_s4 }
 0x41e   : > { %v1142_v58 = vpop.xlane.xlu1 %1141 }
 0x41f   : > { %v1146_v59 = vsub.f32 %v1137_v50, %v1142_v58 }
 0x421   : > { %v1148_v60 = vmul.f32 1.442695, %v1146_v59 }
 0x422   : > { %v1145_v61 = vpop.xlane.xlu1 %1144 }
 0x423   : > { %2770 = vpow2.f32 %v1148_v60  ;;  %v1147_v62 = vsub.f32 %v1138_v56, %v1145_v61 }
 0x425   : > { %v1150_v63 = vmul.f32 1.442695, %v1147_v62 }
 0x426   : > { %v1163_v0 = vpop.permute.xlu1 %1162 }
 0x427   : > { %2772 = vpow2.f32 %v1150_v63  ;;  %2601 = vmatpush3.msra.mxu0 %v1163_v0 }
 0x428   : > { %2610 = vmatprep.subr.mxu0 %v2834_v38 }
 0x42a   : > { %v1239_v1 = vpop.permute.xlu1 %1238 }
 0x42b   : > { %2606 = vmatpush3.msra.mxu1 %v1239_v1 }
 0x42c   : > { %2615 = vmatprep.subr.mxu1 %v2834_v38 }
 0x42d   : > { %v2771_v2 = vpop.eup %2770 }
 0x42e   : > { %v1152_v3 = vsel %vm1139_vm4, %v2771_v2, 0.0  ;;  %v1317_v6 = vpop.permute.xlu1 %1316 }
 0x42f   : > { %1153 = vadd.xlane.f32.xlu0 %v1152_v3 }
 0x431   : > { %v2773_v4 = vpop.eup %2772 }
 0x432   : > { %v1155_v5 = vsel %vm1139_vm4, %v2773_v4, 0.0  ;;  %v1395_v7 = vpop.permute.xlu1 %1394 }
 0x433   : > { %1156 = vadd.xlane.f32.xlu1 %v1155_v5 }
 0x444   : > { %1392 = vrot.lane.b32.xlu1 %v3068_v43, %s2839_s30 }
 0x445   : > { %1314 = vrot.lane.b32.xlu0 %v3065_v42, %s2839_s30 }
 0x4bc   : > { %v1154_v8 = vpop.xlane.xlu0 %1153 }
 0x4bd   : > { %2774 = vrcp.f32 %v1154_v8 }
 0x4c0   : > { %v1157_v9 = vpop.xlane.xlu1 %1156  ;;  %v1315_v14 = vpop.permute.xlu0 %1314 }
 0x4c1   : > { %2776 = vrcp.f32 %v1157_v9 }
 0x4c4   : > { %v1393_v15 = vpop.permute.xlu1 %1392 }
 0x4c7   : > { %v2775_v10 = vpop.eup %2774 }
 0x4c8   : > { %v1160_v11 = vmul.f32 %v2775_v10, %v2771_v2 }
 0x4ca   : > { %2603 = vmatmul.mubr.msk.f32.vlgmr.msra.gmra.mrb[0].mxu0 %vm1139_vm4, %v1160_v11 }
 0x4cb   : > { %v2777_v12 = vpop.eup %2776  ;;  %2611 = vmatpush3.xpose.msk.msra.mxu0 %vm971_vm3, %v1317_v6  ;;  %2612 = vmatprep.mubr.msk.f32.mxu0 %vm2835_vm2, %v2834_v38 }
 0x4cc   : > { %v1161_v13 = vmul.f32 %v2777_v12, %v2773_v4  ;;  %2620 = vmatprep.subr.mxu0 %v2834_v38 }
 0x4ce   : > { %2608 = vmatmul.mubr.msk.f32.vlgmr.msra.gmra.mrb[6].mxu1 %vm1139_vm4, %v1161_v13  ;;  %2613 = vmatmul.mubr.msk.f32.vlgmr.msra.gmra.mrb[2].mxu0 %vm971_vm3, %v1315_v14  ;;  %v1866_v13 = vld [vmem:[%s2999_s6] sm:$0xff]  ;;  %v1867_v14 = vld [vmem:[%s2999_s6 + $0x8] sm:$0xff] }
 0x4cf   : > { %2616 = vmatpush3.xpose.msk.msra.mxu1 %vm971_vm3, %v1395_v7  ;;  %2617 = vmatprep.mubr.msk.f32.mxu1 %vm2835_vm2, %v2834_v38 }
 0x4d0   : > { %2625 = vmatprep.subr.mxu1 %v2834_v38  ;;  %2622 = vmatprep.mubr.msk.f32.mxu0 %vm2835_vm2, %v2834_v38 }
 0x4d2   : > { %2618 = vmatmul.mubr.msk.f32.vlgmr.msra.gmra.mrb[8].mxu1 %vm971_vm3, %v1393_v15  ;;  %v2701_v15 = vpack.c.bf16 %v1867_v14, %v1866_v13 }
 0x4d3   : > { %2627 = vmatprep.mubr.msk.f32.mxu1 %vm2835_vm2, %v2834_v38 }
 0x59d   : > { %v3123_v16 = vpop.f32.mrb[0].mxu0 }
 0x59e   : > { %v2604_v17 = vpop.f32.mrb[1].mxu0 }
 0x59f   : > { %v1869_v17 = vld [vmem:[%s2999_s6 + $0x18] sm:$0xff] }
 0x5a1   : > { %v1310_v18 = vpop.f32.mrb[6].mxu1  ;;  %v1388_v19 = vpop.f32.mrb[2].mxu0 }
 0x5a2   : > { %v1470_v20 = vmul.f32 0.25, %v1388_v19  ;;  %v2609_v21 = vpop.f32.mrb[7].mxu1  ;;  %v2614_v22 = vpop.f32.mrb[3].mxu0 }
 0x5a4   : > { %v1472_v23 = vadd.f32 %v3086_v47, %v1470_v20 }
 0x5a5   : > { %v1466_v24 = vpop.f32.mrb[8].mxu1 }
 0x5a6   : > { %v1471_v25 = vmul.f32 0.25, %v1466_v24  ;;  %v2619_v26 = vpop.f32.mrb[9].mxu1  ;;  %v1474_v27 = vsel %vm1139_vm4, %v1472_v23, -inf }
 0x5a7   : > { %1475 = vmax.xlane.f32.xlu1 %v1474_v27 }
 0x5a8   : > { %v1473_v28 = vadd.f32 %v3092_v52, %v1471_v25  ;;  %v967_v52 = vld [vmem:[%s2982_s23 + $0x18] sm:$0xff] }
 0x5a9   : > { %v2693_v53 = vpack.c.bf16 %v967_v52, %v966_v51 }
 0x5aa   : > { %v1477_v29 = vsel %vm1139_vm4, %v1473_v28, -inf }
 0x5ab   : > { %1478 = vmax.xlane.f32.xlu0 %v1477_v29 }
 0x5c1   : > { %1572 = vrot.lane.b32.xlu0 %v3068_v43, %s2840_s5 }
 0x634   : > { %v1476_v30 = vpop.xlane.xlu1 %1475 }
 0x635   : > { %v1480_v31 = vsub.f32 %v1472_v23, %v1476_v30  ;;  %v2503_v30 = vld [vmem:[%s3310_s27] ss:$0 sm:$0xff] }
 0x637   : > { %v1482_v32 = vmul.f32 1.442695, %v1480_v31 }
 0x638   : > { %v1479_v33 = vpop.xlane.xlu0 %1478 }
 0x639   : > { %2778 = vpow2.f32 %v1482_v32  ;;  %v1481_v34 = vsub.f32 %v1473_v28, %v1479_v33 }
 0x63b   : > { %v1484_v36 = vmul.f32 1.442695, %v1481_v34 }
 0x63c   : > { %v1573_v38 = vpop.permute.xlu0 %1572 }
 0x63d   : > { %2780 = vpow2.f32 %v1484_v36  ;;  %2626 = vmatpush3.msra.mxu1 %v1573_v38  ;;  %v1976_v36 = vld [vmem:[%s3009_s2] sm:$0xff]  ;;  %v1977_v38 = vld [vmem:[%s3009_s2 + $0x8] sm:$0xff] }
 0x63e   : > { %2702 = vmatprep.subr.bf16.mxu1 %v2701_v15 }
 0x643   : > { %v2779_v39 = vpop.eup %2778 }
 0x644   : > { %v1486_v40 = vsel %vm1139_vm4, %v2779_v39, 0.0 }
 0x645   : > { %1487 = vadd.xlane.f32.xlu1 %v1486_v40  ;;  %v1978_v40 = vld [vmem:[%s3009_s2 + $0x10] sm:$0xff] }
 0x647   : > { %v2781_v41 = vpop.eup %2780 }
 0x648   : > { %v1489_v44 = vsel %vm1139_vm4, %v2781_v41, 0.0 }
 0x649   : > { %1490 = vadd.xlane.f32.xlu1 %v1489_v44 }
 0x65a   : > { %1496 = vrot.lane.b32.xlu1 %v3065_v42, %s2840_s5  ;;  %v964_v42 = vld [vmem:[%s2982_s23] sm:$0xff]  ;;  %s3308_s23 = scalar_lea.vmem %s3267_s9, %s2967_s26 }
 0x65b   : > { %v2697_v55 = vpack.c.bf16 %v965_v54, %v964_v42  ;;  %v2501_v60 = vld [vmem:[%s3308_s23] ss:$0 sm:$0xff] }
 0x6d2   : > { %v1488_v43 = vpop.xlane.xlu1 %1487 }
 0x6d3   : > { %2782 = vrcp.f32 %v1488_v43  ;;  %v1980_v43 = vld [vmem:[%s3009_s2 + $0x20] sm:$0xff] }
 0x6d6   : > { %v1491_v45 = vpop.xlane.xlu1 %1490 }
 0x6d7   : > { %2784 = vrcp.f32 %v1491_v45  ;;  %v1981_v45 = vld [vmem:[%s3009_s2 + $0x28] sm:$0xff] }
 0x6da   : > { %v1497_v46 = vpop.permute.xlu1 %1496 }
 0x6db   : > { %2621 = vmatpush3.msra.mxu0 %v1497_v46  ;;  %v2717_v46 = vpack.c.bf16 %v1981_v45, %v1980_v43 }
 0x6dc   : > { %2694 = vmatprep.subr.bf16.mxu0 %v2693_v53 }
 0x6dd   : > { %v2783_v47 = vpop.eup %2782 }
 0x6de   : > { %v1494_v48 = vmul.f32 %v2783_v47, %v2779_v39  ;;  %v2709_v39 = vpack.c.bf16 %v1977_v38, %v1976_v36  ;;  %v1982_v47 = vld [vmem:[%s3009_s2 + $0x30] sm:$0xff]  ;;  %v2511_v36 = vld [vmem:[%s812_s19] ss:$0 sm:$0xff] }
 0x6e0   : > { %2623 = vmatmul.mubr.msk.f32.vlgmr.msra.gmra.mrb[4].mxu0 %vm1139_vm4, %v1494_v48  ;;  %v1983_v48 = vld [vmem:[%s3009_s2 + $0x38] sm:$0xff] }
 0x6e1   : > { %v2785_v49 = vpop.eup %2784  ;;  %2696 = vmatpush3.bf16.msra.mxu0 %v2693_v53 }
 0x6e2   : > { %v1495_v50 = vmul.f32 %v2785_v49, %v2781_v41  ;;  %2698 = vmatprep.subr.bf16.mxu0 %v2697_v55  ;;  %v1979_v41 = vld [vmem:[%s3009_s2 + $0x18] sm:$0xff]  ;;  %v2721_v49 = vpack.c.bf16 %v1983_v48, %v1982_v47 }
 0x6e3   : > { %v2713_v44 = vpack.c.bf16 %v1979_v41, %v1978_v40 }
 0x6e4   : > { %2628 = vmatmul.mubr.msk.f32.vlgmr.msra.gmra.mrb[10].mxu1 %vm1139_vm4, %v1495_v50  ;;  %v2504_v50 = vld [vmem:[%s798_s8] ss:$0 sm:$0xff] }
 0x6e5   : > { %2704 = vmatpush3.bf16.msra.mxu1 %v2701_v15 }
 0x7b3   : > { %v1568_v56 = vpop.f32.mrb[4].mxu0 }
 0x7b4   : > { %v2624_v57 = vpop.f32.mrb[5].mxu0  ;;  %2634 = vmatprep.mubr.msk.f32.mxu0 %vm971_vm3, %v1568_v56 }
 0x7b7   : > { %v1644_v58 = vpop.f32.mrb[10].mxu1 }
 0x7b8   : > { %v2629_v59 = vpop.f32.mrb[11].mxu1  ;;  %2635 = vmatmul.mubr.msk.f32.vlgmr.msra.gmra.mrb[6].mxu0 %vm971_vm3, %v1644_v58 }
 0x7b9   : > { %2700 = vmatpush3.bf16.msra.mxu0 %v2697_v55  ;;  %2641 = vmatprep.mubr.msk.f32.mxu0 %vm971_vm3, %v3123_v16  ;;  %v1868_v16 = vld [vmem:[%s2999_s6 + $0x10] sm:$0xff]  ;;  %s3309_s6 = scalar_lea.vmem %s3268_s10, %s2967_s26 }
 0x7ba   : > { %v2502_v26 = vld [vmem:[%s3309_s6] ss:$0 sm:$0xff]  ;;  %2710 = vmatprep.subr.bf16.mxu0 %v2709_v39 }
 0x7c0   : > { %2642 = vmatmul.mubr.msk.f32.vlgmr.msra.gmra.mrb[6].mxu0 %vm971_vm3, %v1310_v18  ;;  %v2705_v18 = vpack.c.bf16 %v1869_v17, %v1868_v16 }
 0x7c1   : > { %2712 = vmatpush3.bf16.msra.mxu0 %v2709_v39 }
 0x7c2   : > { %2706 = vmatprep.subr.bf16.mxu1 %v2705_v18  ;;  %2714 = vmatprep.subr.bf16.mxu0 %v2713_v44 }
 0x7c3   : > { %2708 = vmatpush3.bf16.msra.mxu1 %v2705_v18 }
 0x7c5   : > { %2716 = vmatpush3.bf16.msra.mxu0 %v2713_v44 }
 0x7c6   : > { %2718 = vmatprep.subr.bf16.mxu0 %v2717_v46 }
 0x7c9   : > { %2720 = vmatpush3.bf16.msra.mxu0 %v2717_v46 }
 0x7ca   : > { %2722 = vmatprep.subr.bf16.mxu0 %v2721_v49 }
 0x7cd   : > { %2724 = vmatpush3.bf16.msra.mxu0 %v2721_v49 }
 0x893   : > { %v2643_v61 = vpop.f32.mrb[6].mxu0 }
 0x894   : > { %v1818_v62 = vadd.f32 %v2643_v61, %v2501_v60  ;;  %v1801_v63 = vpop.f32.mrb[7].mxu0 }
 0x895   : > { %v1817_v0 = vadd.f32 %v2501_v60, %v1801_v63 }
 0x896   : > { %v1820_v1 = vadd.f32 %v1818_v62, %v3050_v37 }
 0x897   : > { %v1819_v2 = vadd.f32 %v1817_v0, %v3046_v35 }
 0x898   : > { %v1826_v3 = vsel %vm880_vm1, %v1820_v1, 0.0 }
 0x899   : > { %1827 = vadd.xlane.f32.xlu0 %v1826_v3  ;;  %v1823_v4 = vsel %vm880_vm1, %v1819_v2, 0.0 }
 0x89a   : > { %1824 = vadd.xlane.f32.xlu1 %v1823_v4 }
 0x926   : > { %v1828_v5 = vpop.xlane.xlu0 %1827 }
 0x927   : > { %v1831_v6 = vmul.f32 0.03125, %v1828_v5  ;;  %v1825_v7 = vpop.xlane.xlu1 %1824 }
 0x928   : > { %v1830_v8 = vmul.f32 0.03125, %v1825_v7 }
 0x929   : > { %v1833_v9 = vsub.f32 %v1820_v1, %v1831_v6 }
 0x92a   : > { %v1832_v10 = vsub.f32 %v1819_v2, %v1830_v8  ;;  %v2507_v8 = vld [vmem:[%s806_s3] ss:$0 sm:$0xff] }
 0x92b   : > { %v1835_v11 = vmul.f32 %v1833_v9, %v1833_v9 }
 0x92c   : > { %v1834_v37 = vmul.f32 %v1832_v10, %v1832_v10 }
 0x92d   : > { %v1839_v35 = vsel %vm880_vm1, %v1835_v11, 0.0 }
 0x92e   : > { %1840 = vadd.xlane.f32.xlu0 %v1839_v35  ;;  %v1836_v12 = vsel %vm880_vm1, %v1834_v37, 0.0 }
 0x92f   : > { %1837 = vadd.xlane.f32.xlu1 %v1836_v12 }
 0x9bb   : > { %v1841_v19 = vpop.xlane.xlu0 %1840 }
 0x9bc   : > { %v1843_v20 = vmul.f32 0.03125, %v1841_v19  ;;  %v1838_v21 = vpop.xlane.xlu1 %1837 }
 0x9bd   : > { %v1842_v22 = vmul.f32 0.03125, %v1838_v21 }
 0x9be   : > { %v1845_v23 = vadd.f32 1e-12, %v1843_v20 }
 0x9bf   : > { %v1844_v24 = vadd.f32 1e-12, %v1842_v22 }
 0x9c0   : > { %2786 = vrsqrt.f32 %v1845_v23 }
 0x9c1   : > { %2788 = vrsqrt.f32 %v1844_v24 }
 0x9ca   : > { %v2787_v25 = vpop.eup %2786 }
 0x9cb   : > { %v2789_v27 = vpop.eup %2788  ;;  %v1849_v28 = vmul.f32 %v2787_v25, %v1833_v9 }
 0x9cc   : > { %v1848_v29 = vmul.f32 %v2789_v27, %v1832_v10 }
 0x9cd   : > { %v1857_v31 = vmul.f32 %v2502_v26, %v1849_v28 }
 0x9ce   : > { %v1856_v32 = vmul.f32 %v2502_v26, %v1848_v29 }
 0x9cf   : > { %v1865_v34 = vadd.f32 %v2503_v30, %v1857_v31 }
 0x9d0   : > { %v1864_v33 = vadd.f32 %v2503_v30, %v1856_v32  ;;  %v2510_v32 = vld [vmem:[%s809_s0] ss:$0 sm:$0xff] }
 0x9d2   : > { %2652 = vmatprep.mubr.msk.f32.mxu1 %vm880_vm1, %v1864_v33 }
 0x9d3   : > { %2653 = vmatmul.mubr.msk.f32.vlgmr.msra.gmra.mrb[12].mxu1 %vm880_vm1, %v1865_v34 }
 0xaa6   : > { %v2654_v51 = vpop.f32.mrb[12].mxu1 }
 0xaa7   : > { %v1955_v52 = vadd.f32 %v2654_v51, %v2504_v50  ;;  %v1949_v53 = vpop.f32.mrb[13].mxu1 }
 0xaa8   : > { %v1950_v42 = vadd.f32 %v2504_v50, %v1949_v53 }
 0xaa9   : > { %v1959_v54 = vmul.f32 %v1955_v52, %v1955_v52 }
 0xaaa   : > { %v1958_v55 = vmul.f32 %v1950_v42, %v1950_v42 }
 0xaab   : > { %v1961_v56 = vmul.f32 %v1959_v54, %v1955_v52 }
 0xaac   : > { %v1960_v57 = vmul.f32 %v1958_v55, %v1950_v42 }
 0xaad   : > { %v1963_v58 = vmul.f32 0.044715, %v1961_v56 }
 0xaae   : > { %v1962_v59 = vmul.f32 0.044715, %v1960_v57 }
 0xaaf   : > { %v1965_v60 = vadd.f32 %v1963_v58, %v1955_v52 }
 0xab0   : > { %v1964_v61 = vadd.f32 %v1962_v59, %v1950_v42 }
 0xab1   : > { %v1967_v62 = vmul.f32 0.7978846, %v1965_v60 }
 0xab2   : > { %v1966_v63 = vmul.f32 0.7978846, %v1964_v61 }
 0xab3   : > { %2790 = vtanh.f32 %v1967_v62 }
 0xab4   : > { %2792 = vtanh.f32 %v1966_v63 }
 0xabd   : > { %v2791_v0 = vpop.eup %2790 }
 0xabe   : > { %v2793_v1 = vpop.eup %2792  ;;  %v1971_v2 = vadd.f32 1.0, %v2791_v0 }
 0xabf   : > { %v1970_v3 = vadd.f32 1.0, %v2793_v1 }
 0xac0   : > { %v1973_v4 = vmul.f32 0.5, %v1971_v2 }
 0xac1   : > { %v1972_v5 = vmul.f32 0.5, %v1970_v3 }
 0xac2   : > { %v1975_v7 = vmul.f32 %v1973_v4, %v1955_v52 }
 0xac3   : > { %v1974_v6 = vmul.f32 %v1972_v5, %v1950_v42 }
 0xac5   : > { %2671 = vmatprep.mubr.msk.f32.mxu0 %vm1991_vm5, %v1974_v6 }
 0xac6   : > { %2672 = vmatmul.mubr.msk.f32.vlgmr.msra.gmra.mrb[8].mxu0 %vm1991_vm5, %v1975_v7 }
 0xb99   : > { %v2673_v9 = vpop.f32.mrb[8].mxu0 }
 0xb9a   : > { %v2070_v10 = vadd.f32 %v2673_v9, %v2507_v8  ;;  %v2064_v11 = vpop.f32.mrb[9].mxu0 }
 0xb9b   : > { %v2065_v37 = vadd.f32 %v2507_v8, %v2064_v11 }
 0xb9c   : > { %v2074_v35 = vadd.f32 %v2070_v10, %v1865_v34 }
 0xb9d   : > { %v2073_v12 = vadd.f32 %v2065_v37, %v1864_v33 }
 0xb9e   : > { %v2080_v13 = vsel %vm880_vm1, %v2074_v35, 0.0 }
 0xb9f   : > { %2081 = vadd.xlane.f32.xlu0 %v2080_v13  ;;  %v2077_v14 = vsel %vm880_vm1, %v2073_v12, 0.0 }
 0xba0   : > { %2078 = vadd.xlane.f32.xlu1 %v2077_v14 }
 0xc2c   : > { %v2082_v15 = vpop.xlane.xlu0 %2081 }
 0xc2d   : > { %v2084_v16 = vmul.f32 0.03125, %v2082_v15  ;;  %v2079_v17 = vpop.xlane.xlu1 %2078 }
 0xc2e   : > { %v2083_v18 = vmul.f32 0.03125, %v2079_v17 }
 0xc2f   : > { %v2086_v19 = vsub.f32 %v2074_v35, %v2084_v16 }
 0xc30   : > { %v2085_v20 = vsub.f32 %v2073_v12, %v2083_v18 }
 0xc31   : > { %v2088_v21 = vmul.f32 %v2086_v19, %v2086_v19 }
 0xc32   : > { %v2087_v22 = vmul.f32 %v2085_v20, %v2085_v20 }
 0xc33   : > { %v2092_v23 = vsel %vm880_vm1, %v2088_v21, 0.0 }
 0xc34   : > { %2093 = vadd.xlane.f32.xlu0 %v2092_v23  ;;  %v2089_v24 = vsel %vm880_vm1, %v2087_v22, 0.0 }
 0xc35   : > { %2090 = vadd.xlane.f32.xlu1 %v2089_v24 }
 0xcc1   : > { %v2094_v25 = vpop.xlane.xlu0 %2093 }
 0xcc2   : > { %v2096_v26 = vmul.f32 0.03125, %v2094_v25  ;;  %v2091_v27 = vpop.xlane.xlu1 %2090 }
 0xcc3   : > { %v2095_v28 = vmul.f32 0.03125, %v2091_v27 }
 0xcc4   : > { %v2098_v29 = vadd.f32 1e-12, %v2096_v26 }
 0xcc5   : > { %v2097_v30 = vadd.f32 1e-12, %v2095_v28 }
 0xcc6   : > { %2794 = vrsqrt.f32 %v2098_v29 }
 0xcc7   : > { %2796 = vrsqrt.f32 %v2097_v30 }
 0xcd0   : > { %v2795_v31 = vpop.eup %2794  ;;  %2122 = sbr.rel (%p2512_p5) target bundleno = 3289 (0xcd9), region = 108 }
 0xcd1   : > { %v2797_v33 = vpop.eup %2796  ;;  %v2102_v34 = vmul.f32 %v2795_v31, %v2086_v19 }
 0xcd2   : > { %v2101_v38 = vmul.f32 %v2797_v33, %v2085_v20 }
 0xcd3   : > { %v2110_v39 = vmul.f32 %v2510_v32, %v2102_v34 }
 0xcd4   : > { %v2109_v40 = vmul.f32 %v2510_v32, %v2101_v38 }
 0xcd5   : > { %v2118_v41 = vadd.f32 %v2511_v36, %v2110_v39 }
 0xcd6   : > { %v2117_v44 = vadd.f32 %v2511_v36, %v2109_v40 }
 0xcd7   : > { %2124 = vst.msk [vmem:[#allocation2 + $0x8] sm:$0xff] %vm880_vm1, %v2118_v41 }
 0xcd8   : > { %2123 = vst.msk [vmem:[#allocation2] sm:$0xff] %vm880_vm1, %v2117_v44 }
 0xcd9 PF: > { %p2513_p6 = scmp.ne.s32.totalorder %s2961_s25, 1 }
 0xcda   : > { %s3311_s26 = sld [smem:[#allocation15_spill]] (!%p2513_p6)  ;;  %2682 = vmatprep.mubr.msk.f32.mxu0 (!%p2513_p6), %vm880_vm1, %v2117_v44  ;;  %v2841_v49 = vmov (!%p2513_p6), 0   ;;  %s3312_s30 = sld [smem:[#allocation10_spill]] (!%p2513_p6)  ;;  %v2223_v42 = vlaneseq (!%p2513_p6)  ;;  %v2842_v57 = vmov (!%p2513_p6), 0.0   ;;  %vm2274_vm9 = vcmask (!%p2513_p6), 7168  }
 0xcdb   : > { %2128 = sbr.rel (%p2513_p6) target bundleno = 4122 (0x101a), region = 112  ;;  %2798 = vset.pattern.permute.xlu1 (!%p2513_p6), %v2841_v49  ;;  %2799 = vset.pattern.permute.xlu0 (!%p2513_p6), %v2841_v49  ;;  %s3313_s22 = sld [smem:[#allocation16_spill]] (!%p2513_p6) }
 0xcdc   : > { %v2224_v54 = vand.u32 (!%p2513_p6), 127, %v2223_v42  ;;  %s3314_s23 = sld [smem:[#allocation17_spill]] (!%p2513_p6)  ;;  %s2843_s2 = smov (!%p2513_p6), 1.0  }
 0xcdd   : > { %s3315_s21 = sld [smem:[#allocation9_spill]] (!%p2513_p6) }
 0xcde   : > { %vm2225_vm8 = vcmp.lt.s32.totalorder (!%p2513_p6), %v2224_v54, 5 }
 0xce0   : > { %v2129_v43 = vld [vmem:[%s3311_s26] sm:$0xff] (!%p2513_p6)  ;;  %v2130_v45 = vld [vmem:[%s3311_s26 + $0x8] sm:$0xff] (!%p2513_p6)  ;;  %v2131_v46 = vld [vmem:[%s3311_s26 + $0x10] sm:$0xff] (!%p2513_p6) }
 0xce1   : > { %v2725_v47 = vpack.c.bf16 (!%p2513_p6), %v2130_v45, %v2129_v43  ;;  %v2132_v48 = vld [vmem:[%s3311_s26 + $0x18] sm:$0xff] (!%p2513_p6)  ;;  %v2248_v50 = vld [vmem:[%s3312_s30] sm:$0xff] (!%p2513_p6)  ;;  %v2249_v52 = vld [vmem:[%s3312_s30 + $0x8] sm:$0xff] (!%p2513_p6) }
 0xce2   : > { %v2729_v51 = vpack.c.bf16 %v2132_v48, %v2131_v46  ;;  %2251 = vperm.xlu1 %2798, %v2248_v50   ;;  %v2514_v56 = vld [vmem:[%s3313_s22] ss:$0 sm:$0xff] }
 0xce3   : > { %2726 = vmatprep.subr.bf16.mxu0 %v2725_v47  ;;  %v2270_v19 = vld [vmem:[%s3315_s21] sm:$0xff]  ;;  %v2271_v21 = vld [vmem:[%s3315_s21 + $0x8] sm:$0xff] }
 0xce4   : > { %2728 = vmatpush3.bf16.msra.mxu0 %v2725_v47  ;;  %v2287_v28 = vsel %vm2274_vm9, %v2270_v19, 0.0  ;;  %v2288_v29 = vsel %vm2274_vm9, %v2271_v21, 0.0 }
 0xce5   : > { %2730 = vmatprep.subr.bf16.mxu0 %v2729_v51  ;;  %v2289_v31 = vadd.f32 %v2288_v29, %v2287_v28 }
 0xce6   : > { %2254 = vperm.xlu1 %2798, %v2249_v52  }
 0xce8   : > { %2732 = vmatpush3.bf16.msra.mxu0 %v2729_v51 }
 0xceb   : > { %2683 = vmatmul.mubr.msk.f32.vlgmr.msra.gmra.mrb[0].mxu0 %vm880_vm1, %v2118_v41 }
 0xd61   : > { %v2252_v53 = vpop.permute.xlu1 %2251 }
 0xd62   : > { %vm2256_vm7 = vcmp.eq.s32.totalorder %v2224_v54, %v2252_v53 }
 0xd63   : > { %v2517_v60 = vsel %vm2256_vm7, 1.0, %v2842_v57 }
 0xd65   : > { %v2255_v55 = vpop.permute.xlu1 %2254 }
 0xd66   : > { %vm2257_vm6 = vcmp.eq.s32.totalorder %v2224_v54, %v2255_v55 }
 0xd67   : > { %v2518_v58 = vsel %vm2257_vm6, 1.0, %v2842_v57 }
 0xdbe   : > { %v2684_v59 = vpop.f32.mrb[0].mxu0 }
 0xdbf   : > { %v2218_v61 = vadd.f32 %v2684_v59, %v2514_v56  ;;  %v2212_v62 = vpop.f32.mrb[1].mxu0 }
 0xdc0   : > { %v2213_v63 = vadd.f32 %v2514_v56, %v2212_v62 }
 0xdc1   : > { %2222 = vst [vmem:[%s3314_s23 + $0x8] sm:$0xff] %v2218_v61  ;;  %v2263_v0 = vmul.f32 %v2518_v58, %v2218_v61  ;;  %v2227_v3 = vsel %vm2225_vm8, %v2218_v61, -1e+30 }
 0xdc2   : > { %2221 = vst [vmem:[%s3314_s23] sm:$0xff] %v2213_v63  ;;  %v2226_v1 = vsel %vm2225_vm8, %v2213_v63, -1e+30  ;;  %v2262_v2 = vmul.f32 %v2517_v60, %v2213_v63 }
 0xdc3   : > { %2228 = vmax.xlane.f32.xlu0 %v2226_v1 }
 0xdc7   : > { %2230 = vmax.xlane.f32.xlu0 %v2227_v3 }
 0xe50   : > { %v2229_v4 = vpop.xlane.xlu0 %2228 }
 0xe51   : > { %v2232_v5 = vsub.f32 %v2226_v1, %v2229_v4 }
 0xe53   : > { %v2234_v6 = vmul.f32 1.442695, %v2232_v5 }
 0xe54   : > { %v2231_v7 = vpop.xlane.xlu0 %2230 }
 0xe55   : > { %2800 = vpow2.f32 %v2234_v6  ;;  %v2233_v8 = vsub.f32 %v2227_v3, %v2231_v7 }
 0xe57   : > { %v2236_v9 = vmul.f32 1.442695, %v2233_v8 }
 0xe59   : > { %2802 = vpow2.f32 %v2236_v9 }
 0xe5f   : > { %v2801_v10 = vpop.eup %2800 }
 0xe60   : > { %2238 = vadd.xlane.f32.xlu0 %v2801_v10 }
 0xe63   : > { %v2803_v11 = vpop.eup %2802 }
 0xe64   : > { %2264 = vadd.xlane.f32.xlu0 %v2262_v2  ;;  %2240 = vadd.xlane.f32.xlu1 %v2803_v11 }
 0xe68   : > { %2266 = vadd.xlane.f32.xlu0 %v2263_v0 }
 0xeed   : > { %v2239_v37 = vpop.xlane.xlu0 %2238 }
 0xeee   : > { %2804 = vlog2.f32 %v2239_v37 }
 0xef1   : > { %v2241_v35 = vpop.xlane.xlu1 %2240  ;;  %v2265_v14 = vpop.xlane.xlu0 %2264 }
 0xef2   : > { %2806 = vlog2.f32 %v2241_v35 }
 0xef5   : > { %v2267_v22 = vpop.xlane.xlu0 %2266 }
 0xef8   : > { %v2805_v12 = vpop.eup %2804 }
 0xef9   : > { %v2243_v13 = vmul.f32 0.6931472, %v2805_v12 }
 0xefb   : > { %v2246_v15 = vadd.f32 %v2243_v13, %v2229_v4 }
 0xefc   : > { %v2807_v16 = vpop.eup %2806 }
 0xefd   : > { %v2245_v17 = vmul.f32 0.6931472, %v2807_v16  ;;  %v2268_v18 = vsub.f32 %v2246_v15, %v2265_v14 }
 0xeff   : > { %v2247_v20 = vadd.f32 %v2245_v17, %v2231_v7  ;;  %v2272_v23 = vmul.f32 %v2270_v19, %v2268_v18 }
 0xf01   : > { %v2269_v24 = vsub.f32 %v2247_v20, %v2267_v22  ;;  %v2275_v26 = vsel %vm2274_vm9, %v2272_v23, 0.0 }
 0xf03   : > { %v2273_v25 = vmul.f32 %v2271_v21, %v2269_v24 }
 0xf05   : > { %v2276_v27 = vsel %vm2274_vm9, %v2273_v25, 0.0 }
 0xf06   : > { %v2277_v30 = vadd.f32 %v2276_v27, %v2275_v26 }
 0xf08   : > { %2278 = vadd.xlane.f32.xlu0 %v2277_v30 }
 0xf0c   : > { %2290 = vadd.xlane.f32.xlu0 %v2289_v31 }
 0xf95   : > { %v2279_v32 = vpop.xlane.xlu0 %2278 }
 0xf96   : > { %v2280_v33 = vrot.slane %v2279_v32, 4 }
 0xf98   : > { %v2281_v34 = vadd.f32 %v2280_v33, %v2279_v32 }
 0xf99   : > { %v2291_v36 = vpop.xlane.xlu0 %2290 }
 0xf9a   : > { %v2282_v38 = vrot.slane %v2281_v34, 2  ;;  %v2292_v39 = vrot.slane %v2291_v36, 4 }
 0xf9c   : > { %v2293_v40 = vadd.f32 %v2292_v39, %v2291_v36  ;;  %v2283_v41 = vadd.f32 %v2282_v38, %v2281_v34 }
 0xf9e   : > { %v2294_v44 = vrot.slane %v2293_v40, 2  ;;  %v2284_v43 = vrot.slane %v2283_v41, 1 }
 0xfa0   : > { %v2295_v45 = vadd.f32 %v2294_v44, %v2293_v40  ;;  %v2285_v46 = vadd.f32 %v2284_v43, %v2283_v41 }
 0xfa2   : > { %2735 = vpush %v2285_v46  ;;  %v2296_v47 = vrot.slane %v2295_v45, 1 }
 0xfa4   : > { %v2297_v48 = vadd.f32 %v2296_v47, %v2295_v45 }
 0xfa6   : > { %2737 = vpush %v2297_v48 }
 0xfd3   : > { %s2736_s4 = spop %2735 }
 0xfd7   : > { %s2738_s8 = spop %2737 }
 0xfd8   : > { %s2299_s3 = smax.f32 %s2843_s2, %s2738_s8 }
 0xfd9   : > { %v2300_v49 = vstv %s2299_s3 }
 0xfda   : > { %2808 = vrcp.f32 %v2300_v49 }
 0xfe4   : > { %v2809_v50 = vpop.eup %2808 }
 0xfe5   : > { %2739 = vpush %v2809_v50 }
0x1016   : > { %s2740_s5 = spop %2739 }
0x1017   : > { %s2303_s22 = smul.f32 %s2740_s5, %s2736_s4 }
0x1019   : > { %2305 = sst [smem:[#allocation3]] %s2303_s22 }
0x101a PF: > { %p2745_p7 = scmp.eq.s32.totalorder %s2961_s25, 1  ;;  %s3316_s19 = sld [smem:[#allocation18_spill]] }
0x1020   : > { %s2810_s24 = scalar_lea.hbm %s3316_s19, 16 }
0x1021   : > { %p2811_p8 = scmp.ne.s32.totalorder %s3316_s19, %s2810_s24  ;;  %p2816_p11 = scmp.lt.u32.totalorder %s2810_s24, %s3316_s19 }
0x1023   : > { %p2812_p9 = pnand %p2811_p8, %p2745_p7 }
0x1025   : > { %p2813_p10 = pneg %p2812_p9 }
0x1027   : > { %p2818_p12 = pnand %p2816_p11, %p2813_p10 }
0x1029   : > { %2821 = shalt.err (!%p2818_p12)
}
0x102a   : > { %s2844_s4 = smov [#allocation3]  }
0x102b   : > { %2742 = dma.smem_to_hbm (%p2745_p7), %s2844_s4, 16, %s3316_s19, [#allocation4]  }
0x102c   : > { %2827 = dma.done.wait (%p2745_p7), [#allocation4], 16  }
0x102d   : > { %2829 = vsyncadd (%p2745_p7), [#allocation4], 4294967280 }
0x102e   : > { %2325 = sfence }
0x102f PF: > { %s3317_s25 = sld [smem:[#allocation6_spill]] }
0x1035   : > { %s33_s2 = sadd.s32 1, %s3317_s25  }
0x1036   : > { %p30_p13 = scmp.ge.s32.totalorder %s33_s2, 4  }
0x1038   :  { %32 = sbr.rel (!%p30_p13) target bundleno = 14 (0xe), region = 181 }
0x103f   :  { %2331 = vsyncpa [#allocation4], 1 }
0x1040   :  { %2333 = vsyncpa [#allocation4 + $0x1], 1 }

</bundles_post_ra>
